<compile_context>
chip_gen: v6e
topology: v6e:2x2x1
jax: 0.10.0
libtpu: 0.0.40
codegen_flags: <defaults>
</compile_context>

<pallas_src>
import functools

import jax
import jax.numpy as jnp
from jax.experimental import pallas as pl
from jax.experimental.pallas import tpu as pltpu

_EPS = 1e-5
_XPAD_OFF = 8  # sublane-aligned start column of the conv input tile inside the xpad scratch


def _vmem_capacity_bytes():
    try:
        return int(pltpu.get_tpu_info().vmem_capacity_bytes)
    except Exception:
        return 64 * 1024 * 1024  # conservative default (v7x per-core physical VMEM)


# --------------------- fused conv3x3 (+ input BN/ReLU) (+ batch stats) ---------------------

def _conv_bn_stats_kernel(x_top_ref, x_body_ref, x_bot_ref, w_ref, scale_ref, shift_ref,
                          o_ref, stats_ref,
                          xpad_ref, col_ref,
                          *, fuse_input_bn_relu, compute_dtype):
    # x_top_ref : (1, 1,  W, Cin)   row i*th-1 (clamped; masked to zero at the top border)
    # x_body_ref: (1, th, W, Cin)   rows [i*th, (i+1)*th)
    # x_bot_ref : (1, 1,  W, Cin)   row (i+1)*th (clamped; masked to zero at the bottom border)
    # w_ref     : (9*Cin, Cout)     weights flattened (kh, kw, cin) row-major, compute dtype
    # o_ref     : (1, th, W, Cout)
    # stats_ref : (1, 1, 2, Cout)   per-(batch, strip) [sum, sum_sq] of the f32 conv output
    # xpad_ref  : VMEM (th+2, W+16, Cin)  data at columns [8, 8+W), zero cols at 7 and 8+W
    # col_ref   : VMEM (th*W, 9*Cin)      im2col scratch
    th = x_body_ref.shape[1]
    wdim = x_body_ref.shape[2]
    cin = x_body_ref.shape[3]
    cout = o_ref.shape[3]

    i = pl.program_id(1)
    last = pl.num_programs(1) - 1

    if fuse_input_bn_relu:
        scale = scale_ref[...].reshape(1, 1, cin)
        shift = shift_ref[...].reshape(1, 1, cin)

    def prep(tile):
        t = tile.astype(jnp.float32)
        if fuse_input_bn_relu:
            # Previous layer's BN + ReLU, fused into this conv's load path.
            t = jnp.maximum(t * scale + shift, 0.0)
        return t.astype(compute_dtype)

    lo = _XPAD_OFF
    hi = lo + wdim

    # 1-column zero borders.  Rewritten every step: with both grid axes "parallel" a
    # pl.when(first-step) hoist would not be guaranteed to run on every core.
    zcol = jnp.zeros((th + 2, 1, cin), compute_dtype)
    xpad_ref[:, lo - 1:lo, :] = zcol
    xpad_ref[:, hi:hi + 1, :] = zcol

    # Body rows land at a sublane-aligned column offset (unmasked store).
    xpad_ref[1:th + 1, lo:hi, :] = prep(x_body_ref[0])
    # Top / bottom halo rows: neighbour rows, or zero at the image border.
    xpad_ref[0:1, lo:hi, :] = prep(x_top_ref[0]) * (i > 0).astype(compute_dtype)
    xpad_ref[th + 1:th + 2, lo:hi, :] = prep(x_bot_ref[0]) * (i < last).astype(compute_dtype)

    # im2col: tap (kh, kw) occupies columns [(kh*3+kw)*Cin, ...+Cin); the whole 3x3 conv then
    # becomes a single MXU matmul with contraction K = 9*Cin (no per-tap accumulator).
    for kh in range(3):
        for kw in range(3):
            tap = xpad_ref[kh:kh + th, lo - 1 + kw:lo - 1 + kw + wdim, :]
            base = (kh * 3 + kw) * cin
            col_ref[:, base:base + cin] = tap.reshape(th * wdim, cin)

    acc = jnp.dot(col_ref[...], w_ref[...], preferred_element_type=jnp.float32)
    # NOTE: the conv bias is intentionally omitted -- training-mode BN subtracts the batch
    # mean, which absorbs any per-channel constant exactly.

    o_ref[0] = acc.reshape(th, wdim, cout).astype(o_ref.dtype)
    # TODO(synk): for Cout < 128 this store is lane-masked; a lane-dense flat (th, W*Cout)
    # store needs a minor-dim relayout of `acc` that is not guaranteed to lower on all
    # Mosaic versions, so it is left as-is (Cout >= 128 layers are already lane-dense).

    # Per-channel batch statistics from the exact f32 accumulator, one store per strip.
    s = jnp.sum(acc, axis=0, keepdims=True)
    sq = jnp.sum(acc * acc, axis=0, keepdims=True)
    stats_ref[0, 0] = jnp.concatenate([s, sq], axis=0)
    # TODO(synk): E[x^2]-E[x]^2 can cancel for very large N*H*W; a Welford/two-pass variant
    # would be needed for extreme spatial extents.


def _choose_conv_block_rows(h, w, cin, cout, in_bytes, out_bytes, cbytes, budget):
    """Largest divisor of H whose per-strip VMEM working set fits the budget."""
    def cost(th):
        dbuf = 2 * th * w * (cin * in_bytes + cout * out_bytes)      # pipelined in/out blocks
        halo = 4 * w * cin * in_bytes
        scratch = (th + 2) * (w + 16) * cin * cbytes + th * w * 9 * cin * cbytes
        values = th * w * (9 * cin * cbytes + cin * 4 + cout * (4 + out_bytes))
        weights = 2 * 9 * cin * cout * cbytes
        return dbuf + halo + scratch + values + weights

    divisors = sorted(d for d in range(1, h + 1) if h % d == 0)
    best = divisors[0]
    for th in divisors:
        if cost(th) <= budget:
            best = th
    return best


def conv3x3_bn_stats(x, w_hwio, scale, shift, *, fuse_input_bn_relu, out_dtype,
                     compute_dtype=jnp.bfloat16):
    """3x3 same-conv (NHWC / HWIO, no bias) with optional fused input BN+ReLU and fused
    per-(batch, strip) [sum, sum_sq] statistics of the f32 conv output.

    Returns y: (N,H,W,Cout) in out_dtype and stats: (N, n_strips, 2, Cout) f32."""
    n, h, wdim, cin = x.shape
    cout = w_hwio.shape[-1]

    cap = _vmem_capacity_bytes()
    in_b = jnp.dtype(x.dtype).itemsize
    out_b = jnp.dtype(out_dtype).itemsize
    c_b = jnp.dtype(compute_dtype).itemsize
    th = _choose_conv_block_rows(h, wdim, cin, cout, in_b, out_b, c_b, budget=cap // 2)
    n_strips = h // th

    kernel = functools.partial(
        _conv_bn_stats_kernel,
        fuse_input_bn_relu=fuse_input_bn_relu,
        compute_dtype=compute_dtype,
    )

    body_map = lambda b, i: (b, i, 0, 0)
    # Halo blocks are a single row; with block height 1 the block index is the row index.
    top_map = lambda b, i: (b, jnp.maximum(i * th - 1, 0), 0, 0)
    bot_map = lambda b, i: (b, jnp.minimum((i + 1) * th, h - 1), 0, 0)

    w_flat = w_hwio.reshape(9 * cin, cout).astype(compute_dtype)  # (kh, kw, cin) row-major

    flops = 2 * n * h * wdim * 9 * cin * cout
    bytes_accessed = int(x.size * in_b + w_flat.size * c_b
                         + n * h * wdim * cout * out_b + n * n_strips * 2 * cout * 4)
    cost = pl.CostEstimate(flops=flops, transcendentals=0, bytes_accessed=bytes_accessed)

    y, stats = pl.pallas_call(
        kernel,
        out_shape=(jax.ShapeDtypeStruct((n, h, wdim, cout), out_dtype),
                   jax.ShapeDtypeStruct((n, n_strips, 2, cout), jnp.float32)),
        grid_spec=pltpu.PrefetchScalarGridSpec(
            num_scalar_prefetch=0,
            grid=(n, n_strips),
            in_specs=[
                pl.BlockSpec((1, 1, wdim, cin), top_map),
                pl.BlockSpec((1, th, wdim, cin), body_map),
                pl.BlockSpec((1, 1, wdim, cin), bot_map),
                pl.BlockSpec((9 * cin, cout), lambda b, i: (0, 0)),
                pl.BlockSpec((1, cin), lambda b, i: (0, 0)),
                pl.BlockSpec((1, cin), lambda b, i: (0, 0)),
            ],
            out_specs=[
                pl.BlockSpec((1, th, wdim, cout), lambda b, i: (b, i, 0, 0)),
                pl.BlockSpec((1, 1, 2, cout), lambda b, i: (b, i, 0, 0)),
            ],
            scratch_shapes=[
                pltpu.VMEM((th + 2, wdim + 16, cin), compute_dtype),
                pltpu.VMEM((th * wdim, 9 * cin), compute_dtype),
            ],
        ),
        compiler_params=pltpu.CompilerParams(
            # Stats are independent per (batch, strip) block -> both axes parallel, so v7x
            # can shard either axis across its two TensorCores.
            dimension_semantics=("parallel", "parallel"),
            vmem_limit_bytes=int(cap * 3 // 4)),
        cost_estimate=cost,
    )(x, x, x, w_flat,
      scale.reshape(1, cin).astype(jnp.float32),
      shift.reshape(1, cin).astype(jnp.float32))
    return y, stats


# --------------------------------- fused BN + ReLU -----------------------------------------

def _bn_relu_kernel(x_ref, scale_ref, shift_ref, o_ref):
    y = x_ref[...].astype(jnp.float32) * scale_ref[...] + shift_ref[...]
    o_ref[...] = jnp.maximum(y, 0.0).astype(o_ref.dtype)


def _choose_bn_block_rows(h, row_bytes, budget):
    cands = [d for d in range(8, h, 8) if h % d == 0] + [h]
    best = cands[0]
    for tb in sorted(cands):
        if 4 * tb * row_bytes <= budget:  # in + out blocks, double-buffered
            best = tb
    return best


def bn_relu_flat(y_flat, scale, shift, cout, out_dtype):
    """Lane-dense BN+ReLU over a flat (N, H, W*C) view with pre-tiled scale/shift."""
    n, h, wc = y_flat.shape
    wdim = wc // cout
    cap = _vmem_capacity_bytes()
    row_bytes = wc * (jnp.dtype(y_flat.dtype).itemsize + jnp.dtype(out_dtype).itemsize)
    tb = _choose_bn_block_rows(h, row_bytes, budget=cap // 2)

    scale_flat = jnp.tile(scale.astype(jnp.float32), wdim).reshape(1, wc)
    shift_flat = jnp.tile(shift.astype(jnp.float32), wdim).reshape(1, wc)

    # TODO(synk): inside a full UNet this final BN+ReLU would be fused into the consumer
    # (pool / next DoubleConv) exactly like layer-1's BN+ReLU is fused into layer-2's conv.
    return pl.pallas_call(
        _bn_relu_kernel,
        out_shape=jax.ShapeDtypeStruct((n, h, wc), out_dtype),
        grid_spec=pltpu.PrefetchScalarGridSpec(
            num_scalar_prefetch=0,
            grid=(n, h // tb),
            in_specs=[
                pl.BlockSpec((1, tb, wc), lambda b, i: (b, i, 0)),
                pl.BlockSpec((1, wc), lambda b, i: (0, 0)),
                pl.BlockSpec((1, wc), lambda b, i: (0, 0)),
            ],
            out_specs=pl.BlockSpec((1, tb, wc), lambda b, i: (b, i, 0)),
        ),
        compiler_params=pltpu.CompilerParams(
            dimension_semantics=("parallel", "parallel"),
            vmem_limit_bytes=int(cap * 3 // 4)),
    )(y_flat, scale_flat, shift_flat)


# ------------------------------------ DoubleConv glue ---------------------------------------

def init_double_conv_params(key, in_channels, out_channels, mid_channels=None):
    """Deterministic synthetic parameters. Returns list of (w_hwio, b, gamma, beta)."""
    if not mid_channels:
        mid_channels = out_channels
    params = []
    for cin, cout in ((in_channels, mid_channels), (mid_channels, out_channels)):
        key, k1, k2 = jax.random.split(key, 3)
        w = jax.random.normal(k1, (3, 3, cin, cout), jnp.float32) * 0.1  # HWIO
        b = jax.random.normal(k2, (cout,), jnp.float32) * 0.1
        gamma = jnp.ones((cout,), jnp.float32)   # BatchNorm2d default weight
        beta = jnp.zeros((cout,), jnp.float32)   # BatchNorm2d default bias
        params.append((w, b, gamma, beta))
    return params
    # TODO(synk): PyTorch BatchNorm2d also updates running_mean/var (stateful side effect);
    # it does not affect this forward's output and is not replicated here.


def double_conv_forward(params, x_nchw, *, compute_dtype=jnp.bfloat16):
    x = jnp.transpose(x_nchw, (0, 2, 3, 1))  # NCHW -> NHWC
    n, h, w, _ = x.shape
    in_dtype = x.dtype

    scale = shift = None
    y = None
    cout = None
    for layer, (w_hwio, b, gamma, beta) in enumerate(params):
        cin = x.shape[-1]
        fuse = layer > 0
        if fuse:
            scale_in, shift_in = scale, shift           # previous layer's BN+ReLU, fused in
        else:
            scale_in = jnp.ones((cin,), jnp.float32)    # unused (flag off)
            shift_in = jnp.zeros((cin,), jnp.float32)

        # Intermediate activations stored in compute dtype (bf16 by default) to halve the
        # middle HBM pass; BN stats still come from the exact f32 accumulator.
        y, stats = conv3x3_bn_stats(
            x, w_hwio, scale_in, shift_in,
            fuse_input_bn_relu=fuse, out_dtype=compute_dtype, compute_dtype=compute_dtype)
        # Conv bias `b` is folded away: train-mode BN subtracts the batch mean, which
        # absorbs any per-channel constant, so the forward output is unchanged.

        cout = y.shape[-1]
        sums = jnp.sum(stats, axis=(0, 1))              # (2, Cout): [sum, sum_sq]
        cnt = float(n * h * w)
        mean = sums[0] / cnt
        var = sums[1] / cnt - mean * mean               # biased variance (PyTorch BN)
        scale = gamma / jnp.sqrt(var + _EPS)
        shift = beta - mean * scale
        x = y                                           # raw conv output; BN+ReLU deferred

    out = bn_relu_flat(y.reshape(n, h, w * cout), scale, shift, cout, in_dtype)
    return jnp.transpose(out.reshape(n, h, w, cout), (0, 3, 1, 2))  # NHWC -> NCHW


def double_conv_reference(params, x_nchw):
    """Plain-JAX reference replicating PyTorch semantics (NCHW / OIHW, bias included)."""
    x = x_nchw
    for w_hwio, b, gamma, beta in params:
        w_oihw = jnp.transpose(w_hwio, (3, 2, 0, 1))
        y = jax.lax.conv_general_dilated(
            x, w_oihw, window_strides=(1, 1), padding=((1, 1), (1, 1)),
            dimension_numbers=('NCHW', 'OIHW', 'NCHW'))
        y = y + b[None, :, None, None]
        mean = jnp.mean(y, axis=(0, 2, 3))
        var = jnp.var(y, axis=(0, 2, 3))
        y = (y - mean[None, :, None, None]) / jnp.sqrt(var + _EPS)[None, :, None, None]
        y = y * gamma[None, :, None, None] + beta[None, :, None, None]
        x = jnp.maximum(y, 0.0)
    return x


if __name__ == "__main__":
    key = jax.random.PRNGKey(0)
    kx, kp = jax.random.split(key)

    in_channels, out_channels = 3, 8
    x = jax.random.normal(kx, (2, in_channels, 16, 16), jnp.float32)  # NCHW, like PyTorch

    params = init_double_conv_params(kp, in_channels, out_channels)
    ref = jax.block_until_ready(double_conv_reference(params, x))

    # f32 compute path: tight check of kernel structure (tiling, halos, im2col, fusion, stats).
    out_f32 = jax.block_until_ready(
        double_conv_forward(params, x, compute_dtype=jnp.float32))
    assert out_f32.shape == (2, out_channels, 16, 16)
    err_f32 = float(jnp.max(jnp.abs(out_f32 - ref)))
    assert err_f32 < 2e-3, f"f32 mismatch vs reference: {err_f32}"

    # bf16 MXU-operand + bf16 intermediate-storage path (f32 accumulation / f32 BN math).
    out_bf16 = jax.block_until_ready(
        double_conv_forward(params, x, compute_dtype=jnp.bfloat16))
    err_bf16 = float(jnp.max(jnp.abs(out_bf16 - ref)))
    assert err_bf16 < 8e-2, f"bf16 mismatch vs reference: {err_bf16}"

    print("KERNEL_OK")
</pallas_src>

<mosaic_0001>
module attributes {stable_mosaic.version = 11 : i64} {
  func.func @_conv_bn_stats_kernel(%arg0: i32, %arg1: i32, %arg2: memref<1x1x16x3xf32, #tpu.memory_space<vmem>>, %arg3: memref<1x16x16x3xf32, #tpu.memory_space<vmem>>, %arg4: memref<1x1x16x3xf32, #tpu.memory_space<vmem>>, %arg5: memref<27x8xf32, #tpu.memory_space<vmem>>, %arg6: memref<1x3xf32, #tpu.memory_space<vmem>>, %arg7: memref<1x3xf32, #tpu.memory_space<vmem>>, %arg8: memref<1x16x16x8xf32, #tpu.memory_space<vmem>>, %arg9: memref<1x1x2x8xf32, #tpu.memory_space<vmem>>, %arg10: memref<18x32x3xf32, #tpu.memory_space<vmem>>, %arg11: memref<256x27xf32, #tpu.memory_space<vmem>>) attributes {dimension_semantics = [#tpu.dimension_semantics<parallel>, #tpu.dimension_semantics<parallel>], iteration_bounds = array<i64: 2, 1>, scalar_prefetch = 0 : i64, scratch_operands = 2 : i64, tpu.core_type = #tpu.core_type<tc>, window_params = [{transform_indices = @transform_0, window_bounds = array<i64: 1, 1, 16, 3>}, {transform_indices = @transform_1, window_bounds = array<i64: 1, 16, 16, 3>}, {transform_indices = @transform_2, window_bounds = array<i64: 1, 1, 16, 3>}, {pipeline_mode = #tpu.pipeline_mode<synchronous>, transform_indices = @transform_3, window_bounds = array<i64: 27, 8>}, {pipeline_mode = #tpu.pipeline_mode<synchronous>, transform_indices = @transform_4, window_bounds = array<i64: 1, 3>}, {pipeline_mode = #tpu.pipeline_mode<synchronous>, transform_indices = @transform_5, window_bounds = array<i64: 1, 3>}, {transform_indices = @transform_6, window_bounds = array<i64: 1, 16, 16, 8>}, {transform_indices = @transform_7, window_bounds = array<i64: 1, 1, 2, 8>}]} {
    %cst = arith.constant 0.000000e+00 : f32
    %0 = vector.broadcast %cst : f32 to vector<18x1x3xf32>
    %c0 = arith.constant 0 : index
    %c7 = arith.constant 7 : index
    %c0_0 = arith.constant 0 : index
    %1 = vector.load %arg10[%c0, %c7, %c0_0] : memref<18x32x3xf32, #tpu.memory_space<vmem>>, vector<18x1x3xf32>
    tpu.vector_store %arg10[%c0, %c7, %c0_0], %0 {strides = array<i32>} : memref<18x32x3xf32, #tpu.memory_space<vmem>>, vector<18x1x3xf32>,
    %c0_1 = arith.constant 0 : index
    %c24 = arith.constant 24 : index
    %c0_2 = arith.constant 0 : index
    %2 = vector.load %arg10[%c0_1, %c24, %c0_2] : memref<18x32x3xf32, #tpu.memory_space<vmem>>, vector<18x1x3xf32>
    tpu.vector_store %arg10[%c0_1, %c24, %c0_2], %0 {strides = array<i32>} : memref<18x32x3xf32, #tpu.memory_space<vmem>>, vector<18x1x3xf32>,
    %c0_3 = arith.constant 0 : index
    %c0_4 = arith.constant 0 : index
    %c0_5 = arith.constant 0 : index
    %c0_6 = arith.constant 0 : index
    %3 = vector.load %arg3[%c0_3, %c0_4, %c0_5, %c0_6] : memref<1x16x16x3xf32, #tpu.memory_space<vmem>>, vector<1x16x16x3xf32>
    %4 = vector.shape_cast %3 : vector<1x16x16x3xf32> to vector<16x16x3xf32>
    %c1 = arith.constant 1 : index
    %c8 = arith.constant 8 : index
    %c0_7 = arith.constant 0 : index
    %5 = vector.load %arg10[%c1, %c8, %c0_7] : memref<18x32x3xf32, #tpu.memory_space<vmem>>, vector<16x16x3xf32>
    tpu.vector_store %arg10[%c1, %c8, %c0_7], %4 {strides = array<i32>} : memref<18x32x3xf32, #tpu.memory_space<vmem>>, vector<16x16x3xf32>,
    %c0_8 = arith.constant 0 : index
    %c0_9 = arith.constant 0 : index
    %c0_10 = arith.constant 0 : index
    %c0_11 = arith.constant 0 : index
    %6 = vector.load %arg2[%c0_8, %c0_9, %c0_10, %c0_11] : memref<1x1x16x3xf32, #tpu.memory_space<vmem>>, vector<1x1x16x3xf32>
    %7 = vector.shape_cast %6 : vector<1x1x16x3xf32> to vector<1x16x3xf32>
    %c0_i32 = arith.constant 0 : i32
    %8 = arith.cmpi sgt, %arg1, %c0_i32 : i32
    %9 = arith.extui %8 : i1 to i32
    %10 = arith.sitofp %9 : i32 to f32
    %11 = vector.broadcast %10 : f32 to vector<1x16x3xf32>
    %12 = arith.mulf %7, %11 : vector<1x16x3xf32>
    %c0_12 = arith.constant 0 : index
    %c8_13 = arith.constant 8 : index
    %c0_14 = arith.constant 0 : index
    %13 = vector.load %arg10[%c0_12, %c8_13, %c0_14] : memref<18x32x3xf32, #tpu.memory_space<vmem>>, vector<1x16x3xf32>
    tpu.vector_store %arg10[%c0_12, %c8_13, %c0_14], %12 {strides = array<i32>} : memref<18x32x3xf32, #tpu.memory_space<vmem>>, vector<1x16x3xf32>,
    %c0_15 = arith.constant 0 : index
    %c0_16 = arith.constant 0 : index
    %c0_17 = arith.constant 0 : index
    %c0_18 = arith.constant 0 : index
    %14 = vector.load %arg4[%c0_15, %c0_16, %c0_17, %c0_18] : memref<1x1x16x3xf32, #tpu.memory_space<vmem>>, vector<1x1x16x3xf32>
    %15 = vector.shape_cast %14 : vector<1x1x16x3xf32> to vector<1x16x3xf32>
    %c0_i32_19 = arith.constant 0 : i32
    %16 = arith.cmpi slt, %arg1, %c0_i32_19 : i32
    %17 = arith.extui %16 : i1 to i32
    %18 = arith.sitofp %17 : i32 to f32
    %19 = vector.broadcast %18 : f32 to vector<1x16x3xf32>
    %20 = arith.mulf %15, %19 : vector<1x16x3xf32>
    %c17 = arith.constant 17 : index
    %c8_20 = arith.constant 8 : index
    %c0_21 = arith.constant 0 : index
    %21 = vector.load %arg10[%c17, %c8_20, %c0_21] : memref<18x32x3xf32, #tpu.memory_space<vmem>>, vector<1x16x3xf32>
    tpu.vector_store %arg10[%c17, %c8_20, %c0_21], %20 {strides = array<i32>} : memref<18x32x3xf32, #tpu.memory_space<vmem>>, vector<1x16x3xf32>,
    %c0_22 = arith.constant 0 : index
    %c7_23 = arith.constant 7 : index
    %c0_24 = arith.constant 0 : index
    %22 = vector.load %arg10[%c0_22, %c7_23, %c0_24] : memref<18x32x3xf32, #tpu.memory_space<vmem>>, vector<16x16x3xf32>
    %23 = vector.shape_cast %22 : vector<16x16x3xf32> to vector<256x3xf32>
    %c0_25 = arith.constant 0 : index
    %c0_26 = arith.constant 0 : index
    %24 = vector.load %arg11[%c0_25, %c0_26] : memref<256x27xf32, #tpu.memory_space<vmem>>, vector<256x3xf32>
    tpu.vector_store %arg11[%c0_25, %c0_26], %23 {strides = array<i32>} : memref<256x27xf32, #tpu.memory_space<vmem>>, vector<256x3xf32>,
    %c0_27 = arith.constant 0 : index
    %c8_28 = arith.constant 8 : index
    %c0_29 = arith.constant 0 : index
    %25 = vector.load %arg10[%c0_27, %c8_28, %c0_29] : memref<18x32x3xf32, #tpu.memory_space<vmem>>, vector<16x16x3xf32>
    %26 = vector.shape_cast %25 : vector<16x16x3xf32> to vector<256x3xf32>
    %c0_30 = arith.constant 0 : index
    %c3 = arith.constant 3 : index
    %27 = vector.load %arg11[%c0_30, %c3] : memref<256x27xf32, #tpu.memory_space<vmem>>, vector<256x3xf32>
    tpu.vector_store %arg11[%c0_30, %c3], %26 {strides = array<i32>} : memref<256x27xf32, #tpu.memory_space<vmem>>, vector<256x3xf32>,
    %c0_31 = arith.constant 0 : index
    %c9 = arith.constant 9 : index
    %c0_32 = arith.constant 0 : index
    %28 = vector.load %arg10[%c0_31, %c9, %c0_32] : memref<18x32x3xf32, #tpu.memory_space<vmem>>, vector<16x16x3xf32>
    %29 = vector.shape_cast %28 : vector<16x16x3xf32> to vector<256x3xf32>
    %c0_33 = arith.constant 0 : index
    %c6 = arith.constant 6 : index
    %30 = vector.load %arg11[%c0_33, %c6] : memref<256x27xf32, #tpu.memory_space<vmem>>, vector<256x3xf32>
    tpu.vector_store %arg11[%c0_33, %c6], %29 {strides = array<i32>} : memref<256x27xf32, #tpu.memory_space<vmem>>, vector<256x3xf32>,
    %c1_34 = arith.constant 1 : index
    %c7_35 = arith.constant 7 : index
    %c0_36 = arith.constant 0 : index
    %31 = vector.load %arg10[%c1_34, %c7_35, %c0_36] : memref<18x32x3xf32, #tpu.memory_space<vmem>>, vector<16x16x3xf32>
    %32 = vector.shape_cast %31 : vector<16x16x3xf32> to vector<256x3xf32>
    %c0_37 = arith.constant 0 : index
    %c9_38 = arith.constant 9 : index
    %33 = vector.load %arg11[%c0_37, %c9_38] : memref<256x27xf32, #tpu.memory_space<vmem>>, vector<256x3xf32>
    tpu.vector_store %arg11[%c0_37, %c9_38], %32 {strides = array<i32>} : memref<256x27xf32, #tpu.memory_space<vmem>>, vector<256x3xf32>,
    %c1_39 = arith.constant 1 : index
    %c8_40 = arith.constant 8 : index
    %c0_41 = arith.constant 0 : index
    %34 = vector.load %arg10[%c1_39, %c8_40, %c0_41] : memref<18x32x3xf32, #tpu.memory_space<vmem>>, vector<16x16x3xf32>
    %35 = vector.shape_cast %34 : vector<16x16x3xf32> to vector<256x3xf32>
    %c0_42 = arith.constant 0 : index
    %c12 = arith.constant 12 : index
    %36 = vector.load %arg11[%c0_42, %c12] : memref<256x27xf32, #tpu.memory_space<vmem>>, vector<256x3xf32>
    tpu.vector_store %arg11[%c0_42, %c12], %35 {strides = array<i32>} : memref<256x27xf32, #tpu.memory_space<vmem>>, vector<256x3xf32>,
    %c1_43 = arith.constant 1 : index
    %c9_44 = arith.constant 9 : index
    %c0_45 = arith.constant 0 : index
    %37 = vector.load %arg10[%c1_43, %c9_44, %c0_45] : memref<18x32x3xf32, #tpu.memory_space<vmem>>, vector<16x16x3xf32>
    %38 = vector.shape_cast %37 : vector<16x16x3xf32> to vector<256x3xf32>
    %c0_46 = arith.constant 0 : index
    %c15 = arith.constant 15 : index
    %39 = vector.load %arg11[%c0_46, %c15] : memref<256x27xf32, #tpu.memory_space<vmem>>, vector<256x3xf32>
    tpu.vector_store %arg11[%c0_46, %c15], %38 {strides = array<i32>} : memref<256x27xf32, #tpu.memory_space<vmem>>, vector<256x3xf32>,
    %c2 = arith.constant 2 : index
    %c7_47 = arith.constant 7 : index
    %c0_48 = arith.constant 0 : index
    %40 = vector.load %arg10[%c2, %c7_47, %c0_48] : memref<18x32x3xf32, #tpu.memory_space<vmem>>, vector<16x16x3xf32>
    %41 = vector.shape_cast %40 : vector<16x16x3xf32> to vector<256x3xf32>
    %c0_49 = arith.constant 0 : index
    %c18 = arith.constant 18 : index
    %42 = vector.load %arg11[%c0_49, %c18] : memref<256x27xf32, #tpu.memory_space<vmem>>, vector<256x3xf32>
    tpu.vector_store %arg11[%c0_49, %c18], %41 {strides = array<i32>} : memref<256x27xf32, #tpu.memory_space<vmem>>, vector<256x3xf32>,
    %c2_50 = arith.constant 2 : index
    %c8_51 = arith.constant 8 : index
    %c0_52 = arith.constant 0 : index
    %43 = vector.load %arg10[%c2_50, %c8_51, %c0_52] : memref<18x32x3xf32, #tpu.memory_space<vmem>>, vector<16x16x3xf32>
    %44 = vector.shape_cast %43 : vector<16x16x3xf32> to vector<256x3xf32>
    %c0_53 = arith.constant 0 : index
    %c21 = arith.constant 21 : index
    %45 = vector.load %arg11[%c0_53, %c21] : memref<256x27xf32, #tpu.memory_space<vmem>>, vector<256x3xf32>
    tpu.vector_store %arg11[%c0_53, %c21], %44 {strides = array<i32>} : memref<256x27xf32, #tpu.memory_space<vmem>>, vector<256x3xf32>,
    %c2_54 = arith.constant 2 : index
    %c9_55 = arith.constant 9 : index
    %c0_56 = arith.constant 0 : index
    %46 = vector.load %arg10[%c2_54, %c9_55, %c0_56] : memref<18x32x3xf32, #tpu.memory_space<vmem>>, vector<16x16x3xf32>
    %47 = vector.shape_cast %46 : vector<16x16x3xf32> to vector<256x3xf32>
    %c0_57 = arith.constant 0 : index
    %c24_58 = arith.constant 24 : index
    %48 = vector.load %arg11[%c0_57, %c24_58] : memref<256x27xf32, #tpu.memory_space<vmem>>, vector<256x3xf32>
    tpu.vector_store %arg11[%c0_57, %c24_58], %47 {strides = array<i32>} : memref<256x27xf32, #tpu.memory_space<vmem>>, vector<256x3xf32>,
    %c0_59 = arith.constant 0 : index
    %c0_60 = arith.constant 0 : index
    %49 = vector.load %arg11[%c0_59, %c0_60] : memref<256x27xf32, #tpu.memory_space<vmem>>, vector<256x27xf32>
    %c0_61 = arith.constant 0 : index
    %c0_62 = arith.constant 0 : index
    %50 = vector.load %arg5[%c0_61, %c0_62] : memref<27x8xf32, #tpu.memory_space<vmem>>, vector<27x8xf32>
    %cst_63 = arith.constant dense<0.000000e+00> : vector<256x8xf32>
    %51 = tpu.matmul %49, %50, %cst_63 {dimension_numbers = #tpu.dot_dimension_numbers<[1], [0], [0], [1], [0, 0, 1, 1], [], []>} : vector<256x27xf32>, vector<27x8xf32>, vector<256x8xf32> -> vector<256x8xf32>
    %52 = vector.shape_cast %51 : vector<256x8xf32> to vector<16x16x8xf32>
    %c0_64 = arith.constant 0 : index
    %c0_65 = arith.constant 0 : index
    %c0_66 = arith.constant 0 : index
    %c0_67 = arith.constant 0 : index
    %53 = vector.load %arg8[%c0_64, %c0_65, %c0_66, %c0_67] : memref<1x16x16x8xf32, #tpu.memory_space<vmem>>, vector<1x16x16x8xf32>
    %54 = vector.shape_cast %53 : vector<1x16x16x8xf32> to vector<16x16x8xf32>
    %55 = vector.shape_cast %52 : vector<16x16x8xf32> to vector<1x16x16x8xf32>
    tpu.vector_store %arg8[%c0_64, %c0_65, %c0_66, %c0_67], %55 {strides = array<i32>} : memref<1x16x16x8xf32, #tpu.memory_space<vmem>>, vector<1x16x16x8xf32>,
    %cst_68 = arith.constant dense<0.000000e+00> : vector<8xf32>
    %56 = vector.multi_reduction <add>, %51, %cst_68 [0] : vector<256x8xf32> to vector<8xf32>
    %57 = vector.shape_cast %56 : vector<8xf32> to vector<1x8xf32>
    %58 = arith.mulf %51, %51 : vector<256x8xf32>
    %cst_69 = arith.constant dense<0.000000e+00> : vector<8xf32>
    %59 = vector.multi_reduction <add>, %58, %cst_69 [0] : vector<256x8xf32> to vector<8xf32>
    %60 = vector.shape_cast %59 : vector<8xf32> to vector<1x8xf32>
    %61 = tpu.concatenate %57, %60 in 0 : vector<1x8xf32>, vector<1x8xf32> -> vector<2x8xf32>
    %c0_70 = arith.constant 0 : index
    %c0_71 = arith.constant 0 : index
    %c0_72 = arith.constant 0 : index
    %c0_73 = arith.constant 0 : index
    %62 = vector.load %arg9[%c0_70, %c0_71, %c0_72, %c0_73] : memref<1x1x2x8xf32, #tpu.memory_space<vmem>>, vector<1x1x2x8xf32>
    %63 = vector.shape_cast %62 : vector<1x1x2x8xf32> to vector<2x8xf32>
    %64 = vector.shape_cast %61 : vector<2x8xf32> to vector<1x1x2x8xf32>
    tpu.vector_store %arg9[%c0_70, %c0_71, %c0_72, %c0_73], %64 {strides = array<i32>} : memref<1x1x2x8xf32, #tpu.memory_space<vmem>>, vector<1x1x2x8xf32>,
    return
  }
  func.func @transform_0(%arg0: i32, %arg1: i32) -> (i32, i32, i32, i32) {
    %c16_i32 = arith.constant 16 : i32
    %0 = arith.muli %arg1, %c16_i32 : i32
    %c1_i32 = arith.constant 1 : i32
    %1 = arith.subi %0, %c1_i32 : i32
    %c0_i32 = arith.constant 0 : i32
    %2 = arith.maxsi %1, %c0_i32 : i32
    %c0_i32_0 = arith.constant 0 : i32
    %c0_i32_1 = arith.constant 0 : i32
    %c0_i32_2 = arith.constant 0 : i32
    return %arg0, %2, %c0_i32_0, %c0_i32_1 : i32, i32, i32, i32
  }
  func.func @transform_1(%arg0: i32, %arg1: i32) -> (i32, i32, i32, i32) {
    %c0_i32 = arith.constant 0 : i32
    %c0_i32_0 = arith.constant 0 : i32
    %c0_i32_1 = arith.constant 0 : i32
    return %arg0, %arg1, %c0_i32, %c0_i32_0 : i32, i32, i32, i32
  }
  func.func @transform_2(%arg0: i32, %arg1: i32) -> (i32, i32, i32, i32) {
    %c1_i32 = arith.constant 1 : i32
    %0 = arith.addi %arg1, %c1_i32 : i32
    %c16_i32 = arith.constant 16 : i32
    %1 = arith.muli %0, %c16_i32 : i32
    %c15_i32 = arith.constant 15 : i32
    %2 = arith.minsi %1, %c15_i32 : i32
    %c0_i32 = arith.constant 0 : i32
    %c0_i32_0 = arith.constant 0 : i32
    %c0_i32_1 = arith.constant 0 : i32
    return %arg0, %2, %c0_i32, %c0_i32_0 : i32, i32, i32, i32
  }
  func.func @transform_3(%arg0: i32, %arg1: i32) -> (i32, i32) {
    %c0_i32 = arith.constant 0 : i32
    %c0_i32_0 = arith.constant 0 : i32
    %c0_i32_1 = arith.constant 0 : i32
    return %c0_i32, %c0_i32_0 : i32, i32
  }
  func.func @transform_4(%arg0: i32, %arg1: i32) -> (i32, i32) {
    %c0_i32 = arith.constant 0 : i32
    %c0_i32_0 = arith.constant 0 : i32
    %c0_i32_1 = arith.constant 0 : i32
    return %c0_i32, %c0_i32_0 : i32, i32
  }
  func.func @transform_5(%arg0: i32, %arg1: i32) -> (i32, i32) {
    %c0_i32 = arith.constant 0 : i32
    %c0_i32_0 = arith.constant 0 : i32
    %c0_i32_1 = arith.constant 0 : i32
    return %c0_i32, %c0_i32_0 : i32, i32
  }
  func.func @transform_6(%arg0: i32, %arg1: i32) -> (i32, i32, i32, i32) {
    %c0_i32 = arith.constant 0 : i32
    %c0_i32_0 = arith.constant 0 : i32
    %c0_i32_1 = arith.constant 0 : i32
    return %arg0, %arg1, %c0_i32, %c0_i32_0 : i32, i32, i32, i32
  }
  func.func @transform_7(%arg0: i32, %arg1: i32) -> (i32, i32, i32, i32) {
    %c0_i32 = arith.constant 0 : i32
    %c0_i32_0 = arith.constant 0 : i32
    %c0_i32_1 = arith.constant 0 : i32
    return %arg0, %arg1, %c0_i32, %c0_i32_0 : i32, i32, i32, i32
  }
}

</mosaic_0001>

<bundles_post_ra>
// kernel: tpu_custom_call.1
= control target key start
LH: loop header
LB: loop body
LE: loop exit
PB: predicated region body
PF: predicated region fallthrough
CT: control target
= control target key end

     0   :  { %13 = vsyncpa [#allocation5], 0  ;;  %s4490_s0 = inlined_call_operand.vmem [shape: f32[2,16,16,3], index: 0, kind: input, shape index: {}]   ;;  %s4491_s1 = inlined_call_operand.vmem [shape: f32[2,16,16,3], index: 1, kind: input, shape index: {}]   ;;  %s4492_s2 = inlined_call_operand.vmem [shape: f32[2,16,16,3], index: 2, kind: input, shape index: {}]   ;;  %s4493_s3 = inlined_call_operand.vmem [shape: f32[27,8], index: 3, kind: input, shape index: {}]   ;;  %s4494_s4 = inlined_call_operand.vmem [shape: f32[1,3], index: 4, kind: input, shape index: {}]   ;;  %s4495_s5 = inlined_call_operand.vmem [shape: f32[1,3], index: 5, kind: input, shape index: {}]   ;;  %s4496_s6 = inlined_call_operand.vmem [shape: f32[2,16,16,8], index: 6, kind: output, shape index: {0}]   ;;  %s4497_s7 = inlined_call_operand.hbm [shape: f32[2,1,2,8], index: 7, kind: output, shape index: {1}]  }
   0x1   :  { %15 = vsyncpa [#allocation5 + $0x1], 0  ;;  %s3301_s24 = smov 0   ;;  %s3303_s25 = smov 0  }
   0x2   :  { %s3305_s26 = smov 0   ;;  %s3307_s27 = smov 0  }
   0x3   :  { %s3309_s4 = smov 0   ;;  %s3311_s28 = smov 0  }
   0x4 LB: > { %s2952_s5 = sadd.s32 4294967295, %s3249_s28   ;;  %s2953_s29 = sadd.s32 4294967294, %s3249_s28   ;;  %s3249_s28 = sphi %s3311_s28, %s21_s28   ;;  %s3245_s4 = sphi %s3309_s4, %s4504_s4   ;;  %s3241_s27 = sphi %s3307_s27, %s4503_s27   ;;  %s3237_s26 = sphi %s3305_s26, %s4502_s26   ;;  %s3233_s25 = sphi %s3303_s25, %s4501_s25   ;;  %s3229_s24 = sphi %s3301_s24, %s4500_s24  }
   0x5   : > { %s33_s30 = sadd.s32 1, %s3245_s4  ;;  %s233_s8 = sadd.s32 1, %s3237_s26 }
   0x6   : > { %p35_p0 = scmp.ge.s32.totalorder %s33_s30, 2  ;;  %p243_p1 = scmp.ne.s32.totalorder %s3237_s26, %s3233_s25 }
   0x7   : > { %p244_p2 = scmp.eq.s32.totalorder %s2952_s5, 1  ;;  %p249_p3 = scmp.ne.s32.totalorder %s3233_s25, %s3229_s24 }
   0x8   : > { %s4506_s30 = smov (%p35_p0, %s33_s30), 0  ;;  %p250_p5 = scmp.eq.s32.totalorder %s2953_s29, 1 }
   0x9   : > { %p3341_p4 = por %p244_p2, %p243_p1  ;;  %s228_s10 = ssub.s32 %s3245_s4, %s4506_s30 }
   0xa   : > { %p2956_p6 = scmp.ge.s32.totalorder %s3249_s28, 1  ;;  %p231_p7 = scmp.eq.s32.totalorder %s228_s10, 0 }
   0xb   : > { %p3348_p8 = por %p250_p5, %p249_p3  ;;  %p331_p9 = scmp.lt.s32.totalorder %s3249_s28, 3 }
   0xc   : > { %s3354_s12 = scalar_select %p231_p7, %s3237_s26, %s233_s8  }
   0xd   : > { %p332_p10 = pnand %p2956_p6, %p331_p9 }
   0xe   : > { %p408_p11 = scmp.lt.s32.totalorder (!%p332_p10), %s3241_s27, 1  ;;  %s3252_s21 = smov (!%p332_p10), 3  }
   0xf   : > { %335 = sbr.rel (%p332_p10) target bundleno = 907 (0x38b), region = 44  ;;  %s3253_s22 = smov (!%p332_p10), 6  }
  0x10   : > { %s3254_s23 = smov (!%p332_p10), 9   ;;  %s3255_s5 = smov (!%p332_p10), 12  }
  0x11   : > { %s3256_s29 = smov (!%p332_p10), 15   ;;  %s3257_s8 = smov (!%p332_p10), 18  }
  0x12   : > { %s3258_s15 = smov (!%p332_p10), 21   ;;  %s3259_s10 = smov (!%p332_p10), 24  }
  0x14   : > { %vm460_vm0 = vcmask 16384   ;;  %v3251_v0 = vmov 0.0   ;;  %s409_s13 = scalar_select %p408_p11, %s3241_s27, 1  ;;  %vm530_vm1 = vcmask 23552   ;;  %vm808_vm2 = vcmask 48152  }
  0x15   : > { %479 = vst.msk [vmem:[#allocation2 + $0x18] sm:$0x1] %vm460_vm0, %v3251_v0  ;;  %461 = vst.msk [vmem:[#allocation2 + $0x7] sm:$0x1] %vm460_vm0, %v3251_v0  ;;  %vm2326_vm3 = vcmask 1042432   ;;  %vm1001_vm4 = vcmask 72752  }
  0x16   : > { %462 = vst.msk [vmem:[#allocation2 + $0x27] sm:$0x1] %vm460_vm0, %v3251_v0  ;;  %463 = vst.msk [vmem:[#allocation2 + $0x47] sm:$0x1] %vm460_vm0, %v3251_v0  ;;  %s3396_s14 = sshll.u32 %s409_s13, 8  ;;  %vm1194_vm5 = vcmask 97352  }
  0x17   : > { %464 = vst.msk [vmem:[#allocation2 + $0x67] sm:$0x1] %vm460_vm0, %v3251_v0  ;;  %465 = vst.msk [vmem:[#allocation2 + $0x87] sm:$0x1] %vm460_vm0, %v3251_v0  ;;  %s3402_s17 = scalar_lea.vmem %s4491_s1, %s3396_s14  ;;  %s416_s20 = scalar_lea.vmem %s4490_s0, %s3396_s14  ;;  %vm1387_vm6 = vcmask 121952   ;;  %vm1580_vm7 = vcmask 146552  }
  0x18   : > { %466 = vst.msk [vmem:[#allocation2 + $0xa7] sm:$0x1] %vm460_vm0, %v3251_v0  ;;  %467 = vst.msk [vmem:[#allocation2 + $0xc7] sm:$0x1] %vm460_vm0, %v3251_v0  ;;  %v499_v1 = vld [vmem:[%s3402_s17 + $0x10] sm:$0xff]  ;;  %v497_v2 = vld [vmem:[%s3402_s17] sm:$0xff]  ;;  %s4237_s19 = scalar_lea.vmem %s4496_s6, %s3396_s14 }
  0x19   : > { %468 = vst.msk [vmem:[#allocation2 + $0xe7] sm:$0x1] %vm460_vm0, %v3251_v0  ;;  %469 = vst.msk [vmem:[#allocation2 + $0x107] sm:$0x1] %vm460_vm0, %v3251_v0  ;;  %v501_v3 = vld [vmem:[%s3402_s17 + $0x20] sm:$0xff]  ;;  %v498_v4 = vld [vmem:[%s3402_s17 + $0x8] sm:$0xff] }
  0x1a   : > { %470 = vst.msk [vmem:[#allocation2 + $0x127] sm:$0x1] %vm460_vm0, %v3251_v0  ;;  %471 = vst.msk [vmem:[#allocation2 + $0x147] sm:$0x1] %vm460_vm0, %v3251_v0  ;;  %v503_v5 = vld [vmem:[%s3402_s17 + $0x30] sm:$0xff]  ;;  %v500_v6 = vld [vmem:[%s3402_s17 + $0x18] sm:$0xff] }
  0x1b   : > { %472 = vst.msk [vmem:[#allocation2 + $0x167] sm:$0x1] %vm460_vm0, %v3251_v0  ;;  %473 = vst.msk [vmem:[#allocation2 + $0x187] sm:$0x1] %vm460_vm0, %v3251_v0  ;;  %v502_v7 = vld [vmem:[%s3402_s17 + $0x28] sm:$0xff]  ;;  %v563_v8 = vld [vmem:[%s416_s20] sm:$0xff] }
  0x1c   : > { %474 = vst.msk [vmem:[#allocation2 + $0x1a7] sm:$0x1] %vm460_vm0, %v3251_v0  ;;  %475 = vst.msk [vmem:[#allocation2 + $0x1c7] sm:$0x1] %vm460_vm0, %v3251_v0  ;;  %v504_v9 = vld [vmem:[%s3402_s17 + $0x38] sm:$0xff]  ;;  %v569_v10 = vmul.f32 0.0, %v563_v8 }
  0x1d   : > { %476 = vst.msk [vmem:[#allocation2 + $0x1e7] sm:$0x1] %vm460_vm0, %v3251_v0  ;;  %477 = vst.msk [vmem:[#allocation2 + $0x207] sm:$0x1] %vm460_vm0, %v3251_v0  ;;  %v564_v11 = vld [vmem:[%s416_s20 + $0x8] sm:$0xff]  ;;  %v505_v13 = vld [vmem:[%s3402_s17 + $0x40] sm:$0xff] }
  0x1e   : > { %478 = vst.msk [vmem:[#allocation2 + $0x227] sm:$0x1] %vm460_vm0, %v3251_v0  ;;  %480 = vst.msk [vmem:[#allocation2 + $0x38] sm:$0x1] %vm460_vm0, %v3251_v0  ;;  %v506_v12 = vld [vmem:[%s3402_s17 + $0x48] sm:$0xff]  ;;  %v570_v14 = vmul.f32 0.0, %v564_v11 }
  0x1f   : > { %481 = vst.msk [vmem:[#allocation2 + $0x58] sm:$0x1] %vm460_vm0, %v3251_v0  ;;  %482 = vst.msk [vmem:[#allocation2 + $0x78] sm:$0x1] %vm460_vm0, %v3251_v0  ;;  %v508_v15 = vld [vmem:[%s3402_s17 + $0x58] sm:$0xff]  ;;  %v507_v16 = vld [vmem:[%s3402_s17 + $0x50] sm:$0xff] }
  0x20   : > { %483 = vst.msk [vmem:[#allocation2 + $0x98] sm:$0x1] %vm460_vm0, %v3251_v0  ;;  %484 = vst.msk [vmem:[#allocation2 + $0xb8] sm:$0x1] %vm460_vm0, %v3251_v0  ;;  %v510_v17 = vld [vmem:[%s3402_s17 + $0x68] sm:$0xff]  ;;  %v509_v18 = vld [vmem:[%s3402_s17 + $0x60] sm:$0xff] }
  0x21   : > { %485 = vst.msk [vmem:[#allocation2 + $0xd8] sm:$0x1] %vm460_vm0, %v3251_v0  ;;  %486 = vst.msk [vmem:[#allocation2 + $0xf8] sm:$0x1] %vm460_vm0, %v3251_v0  ;;  %v512_v19 = vld [vmem:[%s3402_s17 + $0x78] sm:$0xff]  ;;  %v511_v20 = vld [vmem:[%s3402_s17 + $0x70] sm:$0xff] }
  0x22   : > { %487 = vst.msk [vmem:[#allocation2 + $0x118] sm:$0x1] %vm460_vm0, %v3251_v0  ;;  %488 = vst.msk [vmem:[#allocation2 + $0x138] sm:$0x1] %vm460_vm0, %v3251_v0  ;;  %v514_v21 = vld [vmem:[%s3402_s17 + $0x88] sm:$0xff]  ;;  %v513_v22 = vld [vmem:[%s3402_s17 + $0x80] sm:$0xff] }
  0x23   : > { %489 = vst.msk [vmem:[#allocation2 + $0x158] sm:$0x1] %vm460_vm0, %v3251_v0  ;;  %490 = vst.msk [vmem:[#allocation2 + $0x178] sm:$0x1] %vm460_vm0, %v3251_v0  ;;  %v516_v23 = vld [vmem:[%s3402_s17 + $0x98] sm:$0xff]  ;;  %v515_v24 = vld [vmem:[%s3402_s17 + $0x90] sm:$0xff] }
  0x24   : > { %491 = vst.msk [vmem:[#allocation2 + $0x198] sm:$0x1] %vm460_vm0, %v3251_v0  ;;  %492 = vst.msk [vmem:[#allocation2 + $0x1b8] sm:$0x1] %vm460_vm0, %v3251_v0  ;;  %v518_v25 = vld [vmem:[%s3402_s17 + $0xa8] sm:$0xff]  ;;  %v517_v26 = vld [vmem:[%s3402_s17 + $0xa0] sm:$0xff] }
  0x25   : > { %493 = vst.msk [vmem:[#allocation2 + $0x1d8] sm:$0x1] %vm460_vm0, %v3251_v0  ;;  %494 = vst.msk [vmem:[#allocation2 + $0x1f8] sm:$0x1] %vm460_vm0, %v3251_v0  ;;  %v520_v31 = vld [vmem:[%s3402_s17 + $0xb8] sm:$0xff]  ;;  %v519_v32 = vld [vmem:[%s3402_s17 + $0xb0] sm:$0xff] }
  0x26   : > { %495 = vst.msk [vmem:[#allocation2 + $0x218] sm:$0x1] %vm460_vm0, %v3251_v0  ;;  %496 = vst.msk [vmem:[#allocation2 + $0x238] sm:$0x1] %vm460_vm0, %v3251_v0  ;;  %v522_v35 = vld [vmem:[%s3402_s17 + $0xc8] sm:$0xff]  ;;  %v521_v37 = vld [vmem:[%s3402_s17 + $0xc0] sm:$0xff] }
  0x27   : > { %533 = vst.msk [vmem:[#allocation2 + $0x48] sm:$0xff] %vm530_vm1, %v499_v1  ;;  %531 = vst.msk [vmem:[#allocation2 + $0x28] sm:$0xff] %vm530_vm1, %v497_v2  ;;  %v524_v38 = vld [vmem:[%s3402_s17 + $0xd8] sm:$0xff]  ;;  %v523_v40 = vld [vmem:[%s3402_s17 + $0xd0] sm:$0xff]  ;;  %vm1774_vm8 = vcmask 171152   ;;  %vm1967_vm9 = vcmask 195752  }
  0x28   : > { %535 = vst.msk [vmem:[#allocation2 + $0x68] sm:$0xff] %vm530_vm1, %v501_v3  ;;  %532 = vst.msk [vmem:[#allocation2 + $0x30] sm:$0xff] %vm530_vm1, %v498_v4  ;;  %v526_v41 = vld [vmem:[%s3402_s17 + $0xe8] sm:$0xff]  ;;  %v525_v42 = vld [vmem:[%s3402_s17 + $0xe0] sm:$0xff]  ;;  %vm2160_vm10 = vcmask 220352   ;;  %vm2229_vm11 = vcmask 220160  }
  0x29   : > { %537 = vst.msk [vmem:[#allocation2 + $0x88] sm:$0xff] %vm530_vm1, %v503_v5  ;;  %534 = vst.msk [vmem:[#allocation2 + $0x50] sm:$0xff] %vm530_vm1, %v500_v6  ;;  %vm2555_vm12 = vcmask 64512   ;;  %vm2758_vm13 = vcmask 1040384   ;;  %vm2760_vm14 = vcmask 58368  }
  0x2a   : > { %536 = vst.msk [vmem:[#allocation2 + $0x70] sm:$0xff] %vm530_vm1, %v502_v7  ;;  %538 = vst.msk [vmem:[#allocation2 + $0x90] sm:$0xff] %vm530_vm1, %v504_v9 }
  0x2b   : > { %540 = vst.msk [vmem:[#allocation2 + $0xb0] sm:$0xff] %vm530_vm1, %v506_v12  ;;  %539 = vst.msk [vmem:[#allocation2 + $0xa8] sm:$0xff] %vm530_vm1, %v505_v13 }
  0x2c   : > { %571 = vst.msk [vmem:[#allocation2 + $0x8] sm:$0xff] %vm530_vm1, %v569_v10  ;;  %542 = vst.msk [vmem:[#allocation2 + $0xd0] sm:$0xff] %vm530_vm1, %v508_v15 }
  0x2d   : > { %541 = vst.msk [vmem:[#allocation2 + $0xc8] sm:$0xff] %vm530_vm1, %v507_v16  ;;  %544 = vst.msk [vmem:[#allocation2 + $0xf0] sm:$0xff] %vm530_vm1, %v510_v17 }
  0x2e   : > { %572 = vst.msk [vmem:[#allocation2 + $0x10] sm:$0xff] %vm530_vm1, %v570_v14  ;;  %543 = vst.msk [vmem:[#allocation2 + $0xe8] sm:$0xff] %vm530_vm1, %v509_v18  ;;  %v3451_v27 = vld [vmem:[#allocation2 + $0x48] sm:$0xff] }
  0x2f   : > { %546 = vst.msk [vmem:[#allocation2 + $0x110] sm:$0xff] %vm530_vm1, %v512_v19  ;;  %545 = vst.msk [vmem:[#allocation2 + $0x108] sm:$0xff] %vm530_vm1, %v511_v20  ;;  %v3453_v28 = vld [vmem:[#allocation2 + $0x28] sm:$0xff]  ;;  %720 = vrot.lane.b32.xlu0 %v3451_v27, %s3252_s21  ;;  %v3464_v30 = vld [vmem:[#allocation2 + $0x30] sm:$0xff] }
  0x30   : > { %548 = vst.msk [vmem:[#allocation2 + $0x130] sm:$0xff] %vm530_vm1, %v514_v21  ;;  %547 = vst.msk [vmem:[#allocation2 + $0x128] sm:$0xff] %vm530_vm1, %v513_v22  ;;  %716 = vrot.lane.b32.xlu1 %v3453_v28, %s3252_s21  ;;  %v3462_v29 = vld [vmem:[#allocation2 + $0x68] sm:$0xff]  ;;  %v3476_v34 = vld [vmem:[#allocation2 + $0x50] sm:$0xff] }
  0x31   : > { %550 = vst.msk [vmem:[#allocation2 + $0x150] sm:$0xff] %vm530_vm1, %v516_v23  ;;  %549 = vst.msk [vmem:[#allocation2 + $0x148] sm:$0xff] %vm530_vm1, %v515_v24  ;;  %v3474_v33 = vld [vmem:[#allocation2 + $0x88] sm:$0xff]  ;;  %v3483_v36 = vld [vmem:[#allocation2 + $0x70] sm:$0xff] }
  0x32   : > { %552 = vst.msk [vmem:[#allocation2 + $0x170] sm:$0xff] %vm530_vm1, %v518_v25  ;;  %551 = vst.msk [vmem:[#allocation2 + $0x168] sm:$0xff] %vm530_vm1, %v517_v26  ;;  %v3499_v43 = vld [vmem:[#allocation2 + $0x90] sm:$0xff]  ;;  %v3506_v46 = vld [vmem:[#allocation2 + $0xa8] sm:$0xff] }
  0x33   : > { %554 = vst.msk [vmem:[#allocation2 + $0x190] sm:$0xff] %vm530_vm1, %v520_v31  ;;  %553 = vst.msk [vmem:[#allocation2 + $0x188] sm:$0xff] %vm530_vm1, %v519_v32  ;;  %724 = vrot.lane.b32.xlu0 %v3462_v29, %s3252_s21  ;;  %v648_v39 = vld [vmem:[#allocation2 + $0x8] sm:$0xff]  ;;  %v3504_v45 = vld [vmem:[#allocation2 + $0xb0] sm:$0xff] }
  0x34   : > { %718 = vrot.lane.b32.xlu1 %v3464_v30, %s3252_s21  ;;  %556 = vst.msk [vmem:[#allocation2 + $0x1b0] sm:$0xff] %vm530_vm1, %v522_v35  ;;  %555 = vst.msk [vmem:[#allocation2 + $0x1a8] sm:$0xff] %vm530_vm1, %v521_v37  ;;  %v661_v47 = vld [vmem:[#allocation2 + $0xd0] sm:$0xff]  ;;  %v660_v48 = vld [vmem:[#allocation2 + $0xc8] sm:$0xff] }
  0x35   : > { %558 = vst.msk [vmem:[#allocation2 + $0x1d0] sm:$0xff] %vm530_vm1, %v524_v38  ;;  %557 = vst.msk [vmem:[#allocation2 + $0x1c8] sm:$0xff] %vm530_vm1, %v523_v40  ;;  %v649_v44 = vld [vmem:[#allocation2 + $0x10] sm:$0xff]  ;;  %v3512_v49 = vld [vmem:[#allocation2 + $0x47] sm:$0xff] }
  0x36   : > { %560 = vst.msk [vmem:[#allocation2 + $0x1f0] sm:$0xff] %vm530_vm1, %v526_v41  ;;  %559 = vst.msk [vmem:[#allocation2 + $0x1e8] sm:$0xff] %vm530_vm1, %v525_v42  ;;  %v3514_v50 = vld [vmem:[#allocation2 + $0x27] sm:$0xff]  ;;  %v3522_v52 = vld [vmem:[#allocation2 + $0x2f] sm:$0xff] }
  0x37   : > { %728 = vrot.lane.b32.xlu0 %v3474_v33, %s3252_s21  ;;  %620 = vst.msk [vmem:[#allocation3 + $0x20] sm:$0xff] %vm530_vm1, %v3512_v49  ;;  %618 = vst.msk [vmem:[#allocation3 + $0x10] sm:$0xff] %vm530_vm1, %v3514_v50  ;;  %v3520_v51 = vld [vmem:[#allocation2 + $0x67] sm:$0xff]  ;;  %v663_v54 = vld [vmem:[#allocation2 + $0xf0] sm:$0xff] }
  0x38   : > { %722 = vrot.lane.b32.xlu1 %v3476_v34, %s3252_s21  ;;  %622 = vst.msk [vmem:[#allocation3 + $0x30] sm:$0xff] %vm530_vm1, %v3520_v51  ;;  %619 = vst.msk [vmem:[#allocation3 + $0x18] sm:$0xff] %vm530_vm1, %v3522_v52  ;;  %v3528_v53 = vld [vmem:[#allocation2 + $0x87] sm:$0xff]  ;;  %v3534_v56 = vld [vmem:[#allocation2 + $0x4f] sm:$0xff] }
  0x39   : > { %v662_v55 = vld [vmem:[#allocation2 + $0xe8] sm:$0xff]  ;;  %624 = vst.msk [vmem:[#allocation3 + $0x40] sm:$0xff] %vm530_vm1, %v3528_v53  ;;  %621 = vst.msk [vmem:[#allocation3 + $0x28] sm:$0xff] %vm530_vm1, %v3534_v56  ;;  %v665_v63 = vld [vmem:[#allocation2 + $0x110] sm:$0xff] }
  0x3a   : > { %v3538_v57 = vld [vmem:[#allocation2 + $0x6f] sm:$0xff]  ;;  %v584_v58 = vld [vmem:[#allocation2 + $0x7] sm:$0xff] }
  0x3b   : > { %712 = vrot.lane.b32.xlu0 %v648_v39, %s3252_s21  ;;  %v3540_v59 = vld [vmem:[#allocation2 + $0x8f] sm:$0xff]  ;;  %623 = vst.msk [vmem:[#allocation3 + $0x38] sm:$0xff] %vm530_vm1, %v3538_v57  ;;  %616 = vst.msk [vmem:[#allocation3] sm:$0xff] %vm530_vm1, %v584_v58  ;;  %v3549_v62 = vld [vmem:[#allocation2 + $0xa7] sm:$0xff] }
  0x3c   : > { %726 = vrot.lane.b32.xlu1 %v3483_v36, %s3252_s21  ;;  %625 = vst.msk [vmem:[#allocation3 + $0x48] sm:$0xff] %vm530_vm1, %v3540_v59  ;;  %v585_v60 = vld [vmem:[#allocation2 + $0xf] sm:$0xff]  ;;  %626 = vst.msk [vmem:[#allocation3 + $0x50] sm:$0xff] %vm530_vm1, %v3549_v62  ;;  %v3558_v2 = vld [vmem:[#allocation2 + $0xc7] sm:$0xff] }
  0x3d   : > { %v3547_v61 = vld [vmem:[#allocation2 + $0xaf] sm:$0xff]  ;;  %617 = vst.msk [vmem:[#allocation3 + $0x8] sm:$0xff] %vm530_vm1, %v585_v60  ;;  %628 = vst.msk [vmem:[#allocation3 + $0x60] sm:$0xff] %vm530_vm1, %v3558_v2  ;;  %v3570_v4 = vld [vmem:[#allocation2 + $0xe7] sm:$0xff] }
  0x3e   : > { %v664_v0 = vld [vmem:[#allocation2 + $0x108] sm:$0xff]  ;;  %627 = vst.msk [vmem:[#allocation3 + $0x58] sm:$0xff] %vm530_vm1, %v3547_v61  ;;  %630 = vst.msk [vmem:[#allocation3 + $0x70] sm:$0xff] %vm530_vm1, %v3570_v4  ;;  %v667_v14 = vld [vmem:[#allocation2 + $0x130] sm:$0xff] }
  0x3f   : > { %714 = vrot.lane.b32.xlu0 %v649_v44, %s3252_s21  ;;  %v3556_v1 = vld [vmem:[#allocation2 + $0xcf] sm:$0xff]  ;;  %v3574_v6 = vld [vmem:[#allocation2 + $0x107] sm:$0xff] }
  0x40   : > { %730 = vrot.lane.b32.xlu1 %v3499_v43, %s3252_s21  ;;  %v3560_v3 = vld [vmem:[#allocation2 + $0xef] sm:$0xff]  ;;  %629 = vst.msk [vmem:[#allocation3 + $0x68] sm:$0xff] %vm530_vm1, %v3556_v1  ;;  %632 = vst.msk [vmem:[#allocation3 + $0x80] sm:$0xff] %vm530_vm1, %v3574_v6  ;;  %v3584_v8 = vld [vmem:[#allocation2 + $0x127] sm:$0xff] }
  0x41   : > { %631 = vst.msk [vmem:[#allocation3 + $0x78] sm:$0xff] %vm530_vm1, %v3560_v3  ;;  %v3572_v5 = vld [vmem:[#allocation2 + $0x10f] sm:$0xff]  ;;  %634 = vst.msk [vmem:[#allocation3 + $0x90] sm:$0xff] %vm530_vm1, %v3584_v8  ;;  %v3594_v10 = vld [vmem:[#allocation2 + $0x147] sm:$0xff] }
  0x42   : > { %633 = vst.msk [vmem:[#allocation3 + $0x88] sm:$0xff] %vm530_vm1, %v3572_v5  ;;  %v3582_v7 = vld [vmem:[#allocation2 + $0x12f] sm:$0xff]  ;;  %v3598_v12 = vld [vmem:[#allocation2 + $0x167] sm:$0xff]  ;;  %636 = vst.msk [vmem:[#allocation3 + $0xa0] sm:$0xff] %vm530_vm1, %v3594_v10 }
  0x43   : > { %732 = vrot.lane.b32.xlu0 %v3506_v46, %s3252_s21  ;;  %v3586_v9 = vld [vmem:[#allocation2 + $0x14f] sm:$0xff]  ;;  %635 = vst.msk [vmem:[#allocation3 + $0x98] sm:$0xff] %vm530_vm1, %v3582_v7  ;;  %638 = vst.msk [vmem:[#allocation3 + $0xb0] sm:$0xff] %vm530_vm1, %v3598_v12  ;;  %v3612_v16 = vld [vmem:[#allocation2 + $0x187] sm:$0xff] }
  0x44   : > { %734 = vrot.lane.b32.xlu1 %v3504_v45, %s3252_s21  ;;  %637 = vst.msk [vmem:[#allocation3 + $0xa8] sm:$0xff] %vm530_vm1, %v3586_v9  ;;  %v3596_v11 = vld [vmem:[#allocation2 + $0x16f] sm:$0xff]  ;;  %640 = vst.msk [vmem:[#allocation3 + $0xc0] sm:$0xff] %vm530_vm1, %v3612_v16  ;;  %v610_v20 = vld [vmem:[#allocation2 + $0x1a7] sm:$0xff] }
  0x45   : > { %639 = vst.msk [vmem:[#allocation3 + $0xb8] sm:$0xff] %vm530_vm1, %v3596_v11  ;;  %v3608_v13 = vld [vmem:[#allocation2 + $0x18f] sm:$0xff]  ;;  %642 = vst.msk [vmem:[#allocation3 + $0xd0] sm:$0xff] %vm530_vm1, %v610_v20  ;;  %v612_v24 = vld [vmem:[#allocation2 + $0x1c7] sm:$0xff] }
  0x46   : > { %v666_v15 = vld [vmem:[#allocation2 + $0x128] sm:$0xff]  ;;  %641 = vst.msk [vmem:[#allocation3 + $0xc8] sm:$0xff] %vm530_vm1, %v3608_v13  ;;  %v669_v18 = vld [vmem:[#allocation2 + $0x150] sm:$0xff]  ;;  %644 = vst.msk [vmem:[#allocation3 + $0xe0] sm:$0xff] %vm530_vm1, %v612_v24 }
  0x47   : > { %736 = vrot.lane.b32.xlu0 %v660_v48, %s3252_s21  ;;  %v611_v17 = vld [vmem:[#allocation2 + $0x1af] sm:$0xff]  ;;  %v614_v32 = vld [vmem:[#allocation2 + $0x1e7] sm:$0xff] }
  0x48   : > { %738 = vrot.lane.b32.xlu1 %v661_v47, %s3252_s21  ;;  %v668_v19 = vld [vmem:[#allocation2 + $0x148] sm:$0xff]  ;;  %643 = vst.msk [vmem:[#allocation3 + $0xd8] sm:$0xff] %vm530_vm1, %v611_v17  ;;  %v671_v22 = vld [vmem:[#allocation2 + $0x170] sm:$0xff]  ;;  %646 = vst.msk [vmem:[#allocation3 + $0xf0] sm:$0xff] %vm530_vm1, %v614_v32 }
  0x49   : > { %v613_v21 = vld [vmem:[#allocation2 + $0x1cf] sm:$0xff] }
  0x4a   : > { %v670_v23 = vld [vmem:[#allocation2 + $0x168] sm:$0xff]  ;;  %645 = vst.msk [vmem:[#allocation3 + $0xe8] sm:$0xff] %vm530_vm1, %v613_v21  ;;  %v673_v26 = vld [vmem:[#allocation2 + $0x190] sm:$0xff] }
  0x4b   : > { %740 = vrot.lane.b32.xlu0 %v662_v55, %s3252_s21  ;;  %v615_v25 = vld [vmem:[#allocation2 + $0x1ef] sm:$0xff] }
  0x4c   : > { %742 = vrot.lane.b32.xlu1 %v663_v54, %s3252_s21  ;;  %v672_v31 = vld [vmem:[#allocation2 + $0x188] sm:$0xff]  ;;  %647 = vst.msk [vmem:[#allocation3 + $0xf8] sm:$0xff] %vm530_vm1, %v615_v25  ;;  %v675_v35 = vld [vmem:[#allocation2 + $0x1b0] sm:$0xff] }
  0x4d   : > { %v674_v37 = vld [vmem:[#allocation2 + $0x1a8] sm:$0xff]  ;;  %v677_v38 = vld [vmem:[#allocation2 + $0x1d0] sm:$0xff] }
  0x4e   : > { %v676_v39 = vld [vmem:[#allocation2 + $0x1c8] sm:$0xff]  ;;  %v679_v40 = vld [vmem:[#allocation2 + $0x1f0] sm:$0xff] }
  0x4f   : > { %744 = vrot.lane.b32.xlu0 %v664_v0, %s3252_s21  ;;  %v678_v41 = vld [vmem:[#allocation2 + $0x1e8] sm:$0xff]  ;;  %v842_v42 = vld [vmem:[#allocation2 + $0x11] sm:$0xff] }
  0x50   : > { %746 = vrot.lane.b32.xlu1 %v665_v63, %s3252_s21  ;;  %v841_v44 = vld [vmem:[#allocation2 + $0x9] sm:$0xff]  ;;  %v3638_v47 = vld [vmem:[#allocation2 + $0x31] sm:$0xff] }
  0x51   : > { %v3640_v48 = vld [vmem:[#allocation2 + $0x29] sm:$0xff]  ;;  %v3646_v54 = vld [vmem:[#allocation2 + $0x51] sm:$0xff] }
  0x52   : > { %v3648_v55 = vld [vmem:[#allocation2 + $0x49] sm:$0xff]  ;;  %v3654_v58 = vld [vmem:[#allocation2 + $0x71] sm:$0xff] }
  0x53   : > { %748 = vrot.lane.b32.xlu0 %v666_v15, %s3252_s21  ;;  %v3656_v60 = vld [vmem:[#allocation2 + $0x69] sm:$0xff]  ;;  %v3662_v63 = vld [vmem:[#allocation2 + $0x91] sm:$0xff] }
  0x54   : > { %750 = vrot.lane.b32.xlu1 %v667_v14, %s3252_s21  ;;  %v3664_v0 = vld [vmem:[#allocation2 + $0x89] sm:$0xff]  ;;  %v3670_v14 = vld [vmem:[#allocation2 + $0xb1] sm:$0xff] }
  0x55   : > { %v3672_v15 = vld [vmem:[#allocation2 + $0xa9] sm:$0xff]  ;;  %v3678_v17 = vld [vmem:[#allocation2 + $0xd1] sm:$0xff] }
  0x56   : > { %v3688_v20 = vld [vmem:[#allocation2 + $0xe9] sm:$0xff]  ;;  %v3694_v21 = vld [vmem:[#allocation2 + $0x111] sm:$0xff] }
  0x57   : > { %752 = vrot.lane.b32.xlu0 %v668_v19, %s3252_s21  ;;  %v3686_v19 = vld [vmem:[#allocation2 + $0xf1] sm:$0xff]  ;;  %v859_v24 = vld [vmem:[#allocation2 + $0x129] sm:$0xff] }
  0x58   : > { %754 = vrot.lane.b32.xlu1 %v669_v18, %s3252_s21  ;;  %v3680_v18 = vld [vmem:[#allocation2 + $0xc9] sm:$0xff]  ;;  %v862_v25 = vld [vmem:[#allocation2 + $0x151] sm:$0xff] }
  0x59   : > { %v863_v32 = vld [vmem:[#allocation2 + $0x169] sm:$0xff] }
  0x5b   : > { %756 = vrot.lane.b32.xlu0 %v670_v23, %s3252_s21  ;;  %v860_v23 = vld [vmem:[#allocation2 + $0x131] sm:$0xff] }
  0x5c   : > { %758 = vrot.lane.b32.xlu1 %v671_v22, %s3252_s21  ;;  %v3696_v22 = vld [vmem:[#allocation2 + $0x109] sm:$0xff] }
  0x5f   : > { %760 = vrot.lane.b32.xlu0 %v672_v31, %s3252_s21  ;;  %v864_v31 = vld [vmem:[#allocation2 + $0x171] sm:$0xff] }
  0x60   : > { %762 = vrot.lane.b32.xlu1 %v673_v26, %s3252_s21  ;;  %v861_v26 = vld [vmem:[#allocation2 + $0x149] sm:$0xff] }
  0x63   : > { %764 = vrot.lane.b32.xlu0 %v674_v37, %s3252_s21  ;;  %v865_v37 = vld [vmem:[#allocation2 + $0x189] sm:$0xff] }
  0x64   : > { %766 = vrot.lane.b32.xlu1 %v675_v35, %s3252_s21  ;;  %v866_v35 = vld [vmem:[#allocation2 + $0x191] sm:$0xff] }
  0x67   : > { %768 = vrot.lane.b32.xlu0 %v676_v39, %s3252_s21  ;;  %v867_v39 = vld [vmem:[#allocation2 + $0x1a9] sm:$0xff] }
  0x68   : > { %770 = vrot.lane.b32.xlu1 %v677_v38, %s3252_s21  ;;  %v868_v38 = vld [vmem:[#allocation2 + $0x1b1] sm:$0xff] }
  0x6b   : > { %772 = vrot.lane.b32.xlu0 %v678_v41, %s3252_s21 }
  0x6c   : > { %774 = vrot.lane.b32.xlu1 %v679_v40, %s3252_s21 }
  0x6f   : > { %905 = vrot.lane.b32.xlu0 %v841_v44, %s3253_s22  ;;  %v869_v44 = vld [vmem:[#allocation2 + $0x1c9] sm:$0xff] }
  0x70   : > { %907 = vrot.lane.b32.xlu1 %v842_v42, %s3253_s22  ;;  %v870_v42 = vld [vmem:[#allocation2 + $0x1d1] sm:$0xff] }
  0x73   : > { %909 = vrot.lane.b32.xlu0 %v3640_v48, %s3253_s22 }
  0x74   : > { %911 = vrot.lane.b32.xlu1 %v3638_v47, %s3253_s22 }
  0x77   : > { %913 = vrot.lane.b32.xlu0 %v3648_v55, %s3253_s22 }
  0x78   : > { %915 = vrot.lane.b32.xlu1 %v3646_v54, %s3253_s22 }
  0x7b   : > { %917 = vrot.lane.b32.xlu0 %v3656_v60, %s3253_s22 }
  0x7c   : > { %919 = vrot.lane.b32.xlu1 %v3654_v58, %s3253_s22 }
  0x7f   : > { %921 = vrot.lane.b32.xlu0 %v3664_v0, %s3253_s22 }
  0x80   : > { %923 = vrot.lane.b32.xlu1 %v3662_v63, %s3253_s22 }
  0x83   : > { %925 = vrot.lane.b32.xlu0 %v3672_v15, %s3253_s22 }
  0x84   : > { %927 = vrot.lane.b32.xlu1 %v3670_v14, %s3253_s22 }
  0x87   : > { %929 = vrot.lane.b32.xlu0 %v3680_v18, %s3253_s22 }
  0x88   : > { %931 = vrot.lane.b32.xlu1 %v3678_v17, %s3253_s22 }
  0x8b   : > { %933 = vrot.lane.b32.xlu0 %v3688_v20, %s3253_s22 }
  0x8c   : > { %935 = vrot.lane.b32.xlu1 %v3686_v19, %s3253_s22 }
  0x8f   : > { %937 = vrot.lane.b32.xlu0 %v3696_v22, %s3253_s22 }
  0x90   : > { %939 = vrot.lane.b32.xlu1 %v3694_v21, %s3253_s22 }
  0x93   : > { %941 = vrot.lane.b32.xlu0 %v859_v24, %s3253_s22 }
  0x94   : > { %943 = vrot.lane.b32.xlu1 %v860_v23, %s3253_s22 }
  0x97   : > { %945 = vrot.lane.b32.xlu0 %v861_v26, %s3253_s22  ;;  %v871_v26 = vld [vmem:[#allocation2 + $0x1e9] sm:$0xff] }
  0x98   : > { %947 = vrot.lane.b32.xlu1 %v862_v25, %s3253_s22  ;;  %v872_v25 = vld [vmem:[#allocation2 + $0x1f1] sm:$0xff] }
  0x9b   : > { %949 = vrot.lane.b32.xlu0 %v863_v32, %s3253_s22 }
  0x9c   : > { %951 = vrot.lane.b32.xlu1 %v864_v31, %s3253_s22 }
  0x9f   : > { %953 = vrot.lane.b32.xlu0 %v865_v37, %s3253_s22 }
  0xa0   : > { %955 = vrot.lane.b32.xlu1 %v866_v35, %s3253_s22 }
  0xa1   : > { %v721_v40 = vpop.permute.xlu0 %720 }
  0xa2   : > { %v717_v41 = vpop.permute.xlu1 %716  ;;  %813 = vst.msk [vmem:[#allocation3 + $0x20] sm:$0xff] %vm808_vm2, %v721_v40 }
  0xa3   : > { %811 = vst.msk [vmem:[#allocation3 + $0x10] sm:$0xff] %vm808_vm2, %v717_v41  ;;  %957 = vrot.lane.b32.xlu0 %v867_v39, %s3253_s22 }
  0xa4   : > { %959 = vrot.lane.b32.xlu1 %v868_v38, %s3253_s22 }
  0xa5   : > { %v725_v23 = vpop.permute.xlu0 %724 }
  0xa6   : > { %v719_v24 = vpop.permute.xlu1 %718  ;;  %815 = vst.msk [vmem:[#allocation3 + $0x30] sm:$0xff] %vm808_vm2, %v725_v23 }
  0xa7   : > { %812 = vst.msk [vmem:[#allocation3 + $0x18] sm:$0xff] %vm808_vm2, %v719_v24  ;;  %961 = vrot.lane.b32.xlu0 %v869_v44, %s3253_s22 }
  0xa8   : > { %963 = vrot.lane.b32.xlu1 %v870_v42, %s3253_s22 }
  0xa9   : > { %v729_v31 = vpop.permute.xlu0 %728 }
  0xaa   : > { %v723_v32 = vpop.permute.xlu1 %722  ;;  %817 = vst.msk [vmem:[#allocation3 + $0x40] sm:$0xff] %vm808_vm2, %v729_v31 }
  0xab   : > { %814 = vst.msk [vmem:[#allocation3 + $0x28] sm:$0xff] %vm808_vm2, %v723_v32  ;;  %965 = vrot.lane.b32.xlu0 %v871_v26, %s3253_s22 }
  0xac   : > { %967 = vrot.lane.b32.xlu1 %v872_v25, %s3253_s22 }
  0xad   : > { %v713_v37 = vpop.permute.xlu0 %712 }
  0xae   : > { %v727_v35 = vpop.permute.xlu1 %726  ;;  %809 = vst.msk [vmem:[#allocation3] sm:$0xff] %vm808_vm2, %v713_v37 }
  0xaf   : > { %816 = vst.msk [vmem:[#allocation3 + $0x38] sm:$0xff] %vm808_vm2, %v727_v35  ;;  %1098 = vrot.lane.b32.xlu0 %v3514_v50, %s3254_s23 }
  0xb0   : > { %1100 = vrot.lane.b32.xlu1 %v3522_v52, %s3254_s23 }
  0xb1   : > { %v715_v39 = vpop.permute.xlu0 %714 }
  0xb2   : > { %v731_v38 = vpop.permute.xlu1 %730  ;;  %810 = vst.msk [vmem:[#allocation3 + $0x8] sm:$0xff] %vm808_vm2, %v715_v39 }
  0xb3   : > { %818 = vst.msk [vmem:[#allocation3 + $0x48] sm:$0xff] %vm808_vm2, %v731_v38  ;;  %1102 = vrot.lane.b32.xlu0 %v3512_v49, %s3254_s23 }
  0xb4   : > { %1104 = vrot.lane.b32.xlu1 %v3534_v56, %s3254_s23 }
  0xb5   : > { %v733_v41 = vpop.permute.xlu0 %732 }
  0xb6   : > { %v735_v40 = vpop.permute.xlu1 %734  ;;  %819 = vst.msk [vmem:[#allocation3 + $0x50] sm:$0xff] %vm808_vm2, %v733_v41 }
  0xb7   : > { %820 = vst.msk [vmem:[#allocation3 + $0x58] sm:$0xff] %vm808_vm2, %v735_v40  ;;  %1106 = vrot.lane.b32.xlu0 %v3520_v51, %s3254_s23 }
  0xb8   : > { %1108 = vrot.lane.b32.xlu1 %v3538_v57, %s3254_s23 }
  0xb9   : > { %v737_v52 = vpop.permute.xlu0 %736 }
  0xba   : > { %v739_v50 = vpop.permute.xlu1 %738  ;;  %821 = vst.msk [vmem:[#allocation3 + $0x60] sm:$0xff] %vm808_vm2, %v737_v52 }
  0xbb   : > { %822 = vst.msk [vmem:[#allocation3 + $0x68] sm:$0xff] %vm808_vm2, %v739_v50  ;;  %1110 = vrot.lane.b32.xlu0 %v3528_v53, %s3254_s23 }
  0xbc   : > { %1112 = vrot.lane.b32.xlu1 %v3540_v59, %s3254_s23 }
  0xbd   : > { %v741_v44 = vpop.permute.xlu0 %740 }
  0xbe   : > { %v743_v42 = vpop.permute.xlu1 %742  ;;  %823 = vst.msk [vmem:[#allocation3 + $0x70] sm:$0xff] %vm808_vm2, %v741_v44  ;;  %v2226_v44 = vld [vmem:[%s4493_s3 + $0x8] sm:$0xff] }
  0xbf   : > { %824 = vst.msk [vmem:[#allocation3 + $0x78] sm:$0xff] %vm808_vm2, %v743_v42  ;;  %1114 = vrot.lane.b32.xlu0 %v3549_v62, %s3254_s23 }
  0xc0   : > { %1116 = vrot.lane.b32.xlu1 %v3547_v61, %s3254_s23 }
  0xc1   : > { %v745_v24 = vpop.permute.xlu0 %744 }
  0xc2   : > { %v747_v23 = vpop.permute.xlu1 %746  ;;  %825 = vst.msk [vmem:[#allocation3 + $0x80] sm:$0xff] %vm808_vm2, %v745_v24 }
  0xc3   : > { %826 = vst.msk [vmem:[#allocation3 + $0x88] sm:$0xff] %vm808_vm2, %v747_v23  ;;  %1118 = vrot.lane.b32.xlu0 %v3558_v2, %s3254_s23 }
  0xc4   : > { %1120 = vrot.lane.b32.xlu1 %v3556_v1, %s3254_s23 }
  0xc5   : > { %v749_v26 = vpop.permute.xlu0 %748 }
  0xc6   : > { %v751_v25 = vpop.permute.xlu1 %750  ;;  %827 = vst.msk [vmem:[#allocation3 + $0x90] sm:$0xff] %vm808_vm2, %v749_v26 }
  0xc7   : > { %828 = vst.msk [vmem:[#allocation3 + $0x98] sm:$0xff] %vm808_vm2, %v751_v25  ;;  %1122 = vrot.lane.b32.xlu0 %v3570_v4, %s3254_s23 }
  0xc8   : > { %1124 = vrot.lane.b32.xlu1 %v3560_v3, %s3254_s23 }
  0xc9   : > { %v753_v32 = vpop.permute.xlu0 %752 }
  0xca   : > { %v755_v31 = vpop.permute.xlu1 %754  ;;  %829 = vst.msk [vmem:[#allocation3 + $0xa0] sm:$0xff] %vm808_vm2, %v753_v32 }
  0xcb   : > { %830 = vst.msk [vmem:[#allocation3 + $0xa8] sm:$0xff] %vm808_vm2, %v755_v31  ;;  %1126 = vrot.lane.b32.xlu0 %v3574_v6, %s3254_s23 }
  0xcc   : > { %1128 = vrot.lane.b32.xlu1 %v3572_v5, %s3254_s23 }
  0xcd   : > { %v757_v37 = vpop.permute.xlu0 %756 }
  0xce   : > { %v759_v35 = vpop.permute.xlu1 %758  ;;  %831 = vst.msk [vmem:[#allocation3 + $0xb0] sm:$0xff] %vm808_vm2, %v757_v37 }
  0xcf   : > { %832 = vst.msk [vmem:[#allocation3 + $0xb8] sm:$0xff] %vm808_vm2, %v759_v35  ;;  %1130 = vrot.lane.b32.xlu0 %v3584_v8, %s3254_s23 }
  0xd0   : > { %1132 = vrot.lane.b32.xlu1 %v3582_v7, %s3254_s23 }
  0xd1   : > { %v761_v39 = vpop.permute.xlu0 %760 }
  0xd2   : > { %v763_v38 = vpop.permute.xlu1 %762  ;;  %833 = vst.msk [vmem:[#allocation3 + $0xc0] sm:$0xff] %vm808_vm2, %v761_v39 }
  0xd3   : > { %834 = vst.msk [vmem:[#allocation3 + $0xc8] sm:$0xff] %vm808_vm2, %v763_v38  ;;  %1134 = vrot.lane.b32.xlu0 %v3594_v10, %s3254_s23 }
  0xd4   : > { %1291 = vrot.lane.b32.xlu1 %v3453_v28, %s3255_s5 }
  0xd5   : > { %v765_v41 = vpop.permute.xlu0 %764 }
  0xd6   : > { %v767_v40 = vpop.permute.xlu1 %766  ;;  %835 = vst.msk [vmem:[#allocation3 + $0xd0] sm:$0xff] %vm808_vm2, %v765_v41 }
  0xd7   : > { %836 = vst.msk [vmem:[#allocation3 + $0xd8] sm:$0xff] %vm808_vm2, %v767_v40  ;;  %1293 = vrot.lane.b32.xlu0 %v3464_v30, %s3255_s5  ;;  %v2227_v30 = vld [vmem:[%s4493_s3 + $0x10] sm:$0xff] }
  0xd8   : > { %1484 = vrot.lane.b32.xlu1 %v3640_v48, %s3256_s29  ;;  %v2228_v48 = vld [vmem:[%s4493_s3 + $0x18] sm:$0x7] }
  0xd9   : > { %v769_v52 = vpop.permute.xlu0 %768  ;;  %3045 = vmatprep.subr.msk.mxu0 %vm2326_vm3, %v2228_v48  ;;  %3101 = vmatprep.subr.msk.mxu1 %vm2326_vm3, %v2228_v48 }
  0xda   : > { %v771_v50 = vpop.permute.xlu1 %770  ;;  %837 = vst.msk [vmem:[#allocation3 + $0xe0] sm:$0xff] %vm808_vm2, %v769_v52  ;;  %3046 = vmatpush3.msk.msra.mxu0 %vm2326_vm3, %v2228_v48  ;;  %3105 = vmatpush3.msk.msra.mxu1 %vm2326_vm3, %v2228_v48 }
  0xdb   : > { %838 = vst.msk [vmem:[#allocation3 + $0xe8] sm:$0xff] %vm808_vm2, %v771_v50  ;;  %1486 = vrot.lane.b32.xlu0 %v3638_v47, %s3256_s29  ;;  %3047 = vmatprep.subr.mxu0 %v2227_v30 }
  0xdc   : > { %1678 = vrot.lane.b32.xlu1 %v3512_v49, %s3257_s8  ;;  %3102 = vmatprep.subr.mxu1 %v2227_v30 }
  0xdd   : > { %v773_v42 = vpop.permute.xlu0 %772  ;;  %3048 = vmatpush3.msra.mxu0 %v2227_v30  ;;  %3106 = vmatpush3.msra.mxu1 %v2227_v30 }
  0xde   : > { %v775_v28 = vpop.permute.xlu1 %774  ;;  %839 = vst.msk [vmem:[#allocation3 + $0xf0] sm:$0xff] %vm808_vm2, %v773_v42  ;;  %3049 = vmatprep.subr.mxu0 %v2226_v44  ;;  %3103 = vmatprep.subr.mxu1 %v2226_v44 }
  0xdf   : > { %840 = vst.msk [vmem:[#allocation3 + $0xf8] sm:$0xff] %vm808_vm2, %v775_v28  ;;  %1680 = vrot.lane.b32.xlu0 %v3534_v56, %s3257_s8  ;;  %v2225_v56 = vld [vmem:[%s4493_s3] sm:$0xff]  ;;  %3050 = vmatpush3.msra.mxu0 %v2226_v44 }
  0xe0   : > { %1871 = vrot.lane.b32.xlu1 %v3451_v27, %s3258_s15  ;;  %3107 = vmatpush3.msra.mxu1 %v2226_v44 }
  0xe1   : > { %v906_v47 = vpop.permute.xlu0 %905  ;;  %3051 = vmatprep.subr.mxu0 %v2225_v56  ;;  %3104 = vmatprep.subr.mxu1 %v2225_v56 }
  0xe2   : > { %v908_v49 = vpop.permute.xlu1 %907  ;;  %1002 = vst.msk [vmem:[#allocation3] sm:$0xff] %vm1001_vm4, %v906_v47  ;;  %3052 = vmatpush3.msra.mxu0 %v2225_v56  ;;  %3108 = vmatpush3.msra.mxu1 %v2225_v56 }
  0xe3   : > { %1003 = vst.msk [vmem:[#allocation3 + $0x8] sm:$0xff] %vm1001_vm4, %v908_v49  ;;  %1295 = vrot.lane.b32.xlu0 %v3451_v27, %s3255_s5 }
  0xe4   : > { %1873 = vrot.lane.b32.xlu1 %v3476_v34, %s3258_s15 }
  0xe5   : > { %v910_v24 = vpop.permute.xlu0 %909 }
  0xe6   : > { %v912_v23 = vpop.permute.xlu1 %911  ;;  %1004 = vst.msk [vmem:[#allocation3 + $0x10] sm:$0xff] %vm1001_vm4, %v910_v24 }
  0xe7   : > { %1005 = vst.msk [vmem:[#allocation3 + $0x18] sm:$0xff] %vm1001_vm4, %v912_v23  ;;  %2064 = vrot.lane.b32.xlu0 %v3648_v55, %s3259_s10 }
  0xe8   : > { %1297 = vrot.lane.b32.xlu1 %v3476_v34, %s3255_s5 }
  0xe9   : > { %v914_v25 = vpop.permute.xlu0 %913 }
  0xea   : > { %v916_v27 = vpop.permute.xlu1 %915  ;;  %1006 = vst.msk [vmem:[#allocation3 + $0x20] sm:$0xff] %vm1001_vm4, %v914_v25 }
  0xeb   : > { %1007 = vst.msk [vmem:[#allocation3 + $0x28] sm:$0xff] %vm1001_vm4, %v916_v27  ;;  %1488 = vrot.lane.b32.xlu0 %v3648_v55, %s3256_s29  ;;  %v1817_v27 = vld [vmem:[#allocation2 + $0xe8] sm:$0xff] }
  0xec   : > { %2066 = vrot.lane.b32.xlu1 %v3646_v54, %s3259_s10 }
  0xed   : > { %v918_v34 = vpop.permute.xlu0 %917 }
  0xee   : > { %v920_v26 = vpop.permute.xlu1 %919  ;;  %1008 = vst.msk [vmem:[#allocation3 + $0x30] sm:$0xff] %vm1001_vm4, %v918_v34 }
  0xef   : > { %1009 = vst.msk [vmem:[#allocation3 + $0x38] sm:$0xff] %vm1001_vm4, %v920_v26  ;;  %1490 = vrot.lane.b32.xlu0 %v3646_v54, %s3256_s29 }
  0xf0   : > { %1682 = vrot.lane.b32.xlu1 %v3520_v51, %s3257_s8 }
  0xf1   : > { %v922_v32 = vpop.permute.xlu0 %921 }
  0xf2   : > { %v924_v31 = vpop.permute.xlu1 %923  ;;  %1010 = vst.msk [vmem:[#allocation3 + $0x40] sm:$0xff] %vm1001_vm4, %v922_v32 }
  0xf3   : > { %1011 = vst.msk [vmem:[#allocation3 + $0x48] sm:$0xff] %vm1001_vm4, %v924_v31  ;;  %1684 = vrot.lane.b32.xlu0 %v3538_v57, %s3257_s8 }
  0xf4   : > { %1875 = vrot.lane.b32.xlu1 %v3462_v29, %s3258_s15 }
  0xf5   : > { %v926_v35 = vpop.permute.xlu0 %925 }
  0xf6   : > { %v928_v55 = vpop.permute.xlu1 %927  ;;  %1012 = vst.msk [vmem:[#allocation3 + $0x50] sm:$0xff] %vm1001_vm4, %v926_v35 }
  0xf7   : > { %1013 = vst.msk [vmem:[#allocation3 + $0x58] sm:$0xff] %vm1001_vm4, %v928_v55  ;;  %1299 = vrot.lane.b32.xlu0 %v3462_v29, %s3255_s5 }
  0xf8   : > { %1877 = vrot.lane.b32.xlu1 %v3483_v36, %s3258_s15 }
  0xf9   : > { %v930_v54 = vpop.permute.xlu0 %929 }
  0xfa   : > { %v932_v51 = vpop.permute.xlu1 %931  ;;  %1014 = vst.msk [vmem:[#allocation3 + $0x60] sm:$0xff] %vm1001_vm4, %v930_v54 }
  0xfb   : > { %1015 = vst.msk [vmem:[#allocation3 + $0x68] sm:$0xff] %vm1001_vm4, %v932_v51  ;;  %2068 = vrot.lane.b32.xlu0 %v3656_v60, %s3259_s10  ;;  %v1819_v51 = vld [vmem:[#allocation2 + $0x108] sm:$0xff] }
  0xfc   : > { %1301 = vrot.lane.b32.xlu1 %v3483_v36, %s3255_s5 }
  0xfd   : > { %v934_v37 = vpop.permute.xlu0 %933 }
  0xfe   : > { %v936_v57 = vpop.permute.xlu1 %935  ;;  %1016 = vst.msk [vmem:[#allocation3 + $0x70] sm:$0xff] %vm1001_vm4, %v934_v37 }
  0xff   : > { %1017 = vst.msk [vmem:[#allocation3 + $0x78] sm:$0xff] %vm1001_vm4, %v936_v57  ;;  %1492 = vrot.lane.b32.xlu0 %v3656_v60, %s3256_s29 }
 0x100   : > { %2070 = vrot.lane.b32.xlu1 %v3654_v58, %s3259_s10 }
 0x101   : > { %v938_v38 = vpop.permute.xlu0 %937 }
 0x102   : > { %v940_v29 = vpop.permute.xlu1 %939  ;;  %1018 = vst.msk [vmem:[#allocation3 + $0x80] sm:$0xff] %vm1001_vm4, %v938_v38 }
 0x103   : > { %1019 = vst.msk [vmem:[#allocation3 + $0x88] sm:$0xff] %vm1001_vm4, %v940_v29  ;;  %1494 = vrot.lane.b32.xlu0 %v3654_v58, %s3256_s29 }
 0x104   : > { %1686 = vrot.lane.b32.xlu1 %v3528_v53, %s3257_s8 }
 0x105   : > { %v942_v39 = vpop.permute.xlu0 %941 }
 0x106   : > { %v944_v36 = vpop.permute.xlu1 %943  ;;  %1020 = vst.msk [vmem:[#allocation3 + $0x90] sm:$0xff] %vm1001_vm4, %v942_v39  ;;  %v1435_v39 = vld [vmem:[#allocation2 + $0x111] sm:$0xff] }
 0x107   : > { %1021 = vst.msk [vmem:[#allocation3 + $0x98] sm:$0xff] %vm1001_vm4, %v944_v36  ;;  %1688 = vrot.lane.b32.xlu0 %v3540_v59, %s3257_s8 }
 0x108   : > { %1879 = vrot.lane.b32.xlu1 %v3474_v33, %s3258_s15 }
 0x109   : > { %v946_v40 = vpop.permute.xlu0 %945 }
 0x10a   : > { %v948_v60 = vpop.permute.xlu1 %947  ;;  %1022 = vst.msk [vmem:[#allocation3 + $0xa0] sm:$0xff] %vm1001_vm4, %v946_v40 }
 0x10b   : > { %1023 = vst.msk [vmem:[#allocation3 + $0xa8] sm:$0xff] %vm1001_vm4, %v948_v60  ;;  %1303 = vrot.lane.b32.xlu0 %v3474_v33, %s3255_s5 }
 0x10c   : > { %1881 = vrot.lane.b32.xlu1 %v3499_v43, %s3258_s15 }
 0x10d   : > { %v950_v58 = vpop.permute.xlu0 %949 }
 0x10e   : > { %v952_v53 = vpop.permute.xlu1 %951  ;;  %1024 = vst.msk [vmem:[#allocation3 + $0xb0] sm:$0xff] %vm1001_vm4, %v950_v58  ;;  %v1821_v58 = vld [vmem:[#allocation2 + $0x128] sm:$0xff] }
 0x10f   : > { %1025 = vst.msk [vmem:[#allocation3 + $0xb8] sm:$0xff] %vm1001_vm4, %v952_v53  ;;  %2072 = vrot.lane.b32.xlu0 %v3664_v0, %s3259_s10 }
 0x110   : > { %1305 = vrot.lane.b32.xlu1 %v3499_v43, %s3255_s5 }
 0x111   : > { %v954_v41 = vpop.permute.xlu0 %953 }
 0x112   : > { %v956_v59 = vpop.permute.xlu1 %955  ;;  %1026 = vst.msk [vmem:[#allocation3 + $0xc0] sm:$0xff] %vm1001_vm4, %v954_v41 }
 0x113   : > { %1027 = vst.msk [vmem:[#allocation3 + $0xc8] sm:$0xff] %vm1001_vm4, %v956_v59  ;;  %1496 = vrot.lane.b32.xlu0 %v3664_v0, %s3256_s29 }
 0x114   : > { %2074 = vrot.lane.b32.xlu1 %v3662_v63, %s3259_s10 }
 0x115   : > { %v958_v50 = vpop.permute.xlu0 %957 }
 0x116   : > { %v960_v33 = vpop.permute.xlu1 %959  ;;  %1028 = vst.msk [vmem:[#allocation3 + $0xd0] sm:$0xff] %vm1001_vm4, %v958_v50 }
 0x117   : > { %1029 = vst.msk [vmem:[#allocation3 + $0xd8] sm:$0xff] %vm1001_vm4, %v960_v33  ;;  %1498 = vrot.lane.b32.xlu0 %v3662_v63, %s3256_s29 }
 0x118   : > { %1690 = vrot.lane.b32.xlu1 %v3549_v62, %s3257_s8 }
 0x119   : > { %v962_v52 = vpop.permute.xlu0 %961 }
 0x11a   : > { %v964_v43 = vpop.permute.xlu1 %963  ;;  %1030 = vst.msk [vmem:[#allocation3 + $0xe0] sm:$0xff] %vm1001_vm4, %v962_v52 }
 0x11b   : > { %1031 = vst.msk [vmem:[#allocation3 + $0xe8] sm:$0xff] %vm1001_vm4, %v964_v43  ;;  %1692 = vrot.lane.b32.xlu0 %v3547_v61, %s3257_s8 }
 0x11c   : > { %1883 = vrot.lane.b32.xlu1 %v3506_v46, %s3258_s15 }
 0x11d   : > { %v966_v28 = vpop.permute.xlu0 %965 }
 0x11e   : > { %v968_v0 = vpop.permute.xlu1 %967  ;;  %1032 = vst.msk [vmem:[#allocation3 + $0xf0] sm:$0xff] %vm1001_vm4, %v966_v28 }
 0x11f   : > { %1033 = vst.msk [vmem:[#allocation3 + $0xf8] sm:$0xff] %vm1001_vm4, %v968_v0  ;;  %1307 = vrot.lane.b32.xlu0 %v3506_v46, %s3255_s5 }
 0x120   : > { %1885 = vrot.lane.b32.xlu1 %v3504_v45, %s3258_s15 }
 0x121   : > { %v1099_v63 = vpop.permute.xlu0 %1098 }
 0x122   : > { %v1101_v62 = vpop.permute.xlu1 %1100  ;;  %1195 = vst.msk [vmem:[#allocation3] sm:$0xff] %vm1194_vm5, %v1099_v63 }
 0x123   : > { %1196 = vst.msk [vmem:[#allocation3 + $0x8] sm:$0xff] %vm1194_vm5, %v1101_v62  ;;  %2076 = vrot.lane.b32.xlu0 %v3672_v15, %s3259_s10 }
 0x124   : > { %1309 = vrot.lane.b32.xlu1 %v3504_v45, %s3255_s5  ;;  %v1815_v45 = vld [vmem:[#allocation2 + $0xc8] sm:$0xff] }
 0x125   : > { %v1103_v42 = vpop.permute.xlu0 %1102 }
 0x126   : > { %v1105_v61 = vpop.permute.xlu1 %1104  ;;  %1197 = vst.msk [vmem:[#allocation3 + $0x10] sm:$0xff] %vm1194_vm5, %v1103_v42  ;;  %v1823_v42 = vld [vmem:[#allocation2 + $0x148] sm:$0xff] }
 0x127   : > { %1198 = vst.msk [vmem:[#allocation3 + $0x18] sm:$0xff] %vm1194_vm5, %v1105_v61  ;;  %1500 = vrot.lane.b32.xlu0 %v3672_v15, %s3256_s29  ;;  %v1816_v15 = vld [vmem:[#allocation2 + $0xd0] sm:$0xff] }
 0x128   : > { %2078 = vrot.lane.b32.xlu1 %v3670_v14, %s3259_s10 }
 0x129   : > { %v1107_v48 = vpop.permute.xlu0 %1106 }
 0x12a   : > { %v1109_v46 = vpop.permute.xlu1 %1108  ;;  %1199 = vst.msk [vmem:[#allocation3 + $0x20] sm:$0xff] %vm1194_vm5, %v1107_v48 }
 0x12b   : > { %1200 = vst.msk [vmem:[#allocation3 + $0x28] sm:$0xff] %vm1194_vm5, %v1109_v46  ;;  %1502 = vrot.lane.b32.xlu0 %v3670_v14, %s3256_s29 }
 0x12c   : > { %1694 = vrot.lane.b32.xlu1 %v3558_v2, %s3257_s8 }
 0x12d   : > { %v1111_v49 = vpop.permute.xlu0 %1110 }
 0x12e   : > { %v1113_v30 = vpop.permute.xlu1 %1112  ;;  %1201 = vst.msk [vmem:[#allocation3 + $0x30] sm:$0xff] %vm1194_vm5, %v1111_v49  ;;  %v1824_v49 = vld [vmem:[#allocation2 + $0x150] sm:$0xff] }
 0x12f   : > { %1202 = vst.msk [vmem:[#allocation3 + $0x38] sm:$0xff] %vm1194_vm5, %v1113_v30  ;;  %1696 = vrot.lane.b32.xlu0 %v3556_v1, %s3257_s8 }
 0x130   : > { %1887 = vrot.lane.b32.xlu1 %v1815_v45, %s3258_s15 }
 0x131   : > { %v1115_v44 = vpop.permute.xlu0 %1114 }
 0x132   : > { %v1117_v47 = vpop.permute.xlu1 %1116  ;;  %1203 = vst.msk [vmem:[#allocation3 + $0x40] sm:$0xff] %vm1194_vm5, %v1115_v44 }
 0x133   : > { %1204 = vst.msk [vmem:[#allocation3 + $0x48] sm:$0xff] %vm1194_vm5, %v1117_v47  ;;  %1311 = vrot.lane.b32.xlu0 %v1815_v45, %s3255_s5 }
 0x134   : > { %1889 = vrot.lane.b32.xlu1 %v1816_v15, %s3258_s15 }
 0x135   : > { %v1119_v14 = vpop.permute.xlu0 %1118 }
 0x136   : > { %v1121_v2 = vpop.permute.xlu1 %1120  ;;  %1205 = vst.msk [vmem:[#allocation3 + $0x50] sm:$0xff] %vm1194_vm5, %v1119_v14 }
 0x137   : > { %1206 = vst.msk [vmem:[#allocation3 + $0x58] sm:$0xff] %vm1194_vm5, %v1121_v2  ;;  %2080 = vrot.lane.b32.xlu0 %v3680_v18, %s3259_s10  ;;  %v528_v2 = vld [vmem:[%s3402_s17 + $0xf8] sm:$0xff] }
 0x138   : > { %1313 = vrot.lane.b32.xlu1 %v1816_v15, %s3255_s5  ;;  %v2016_v15 = vld [vmem:[#allocation2 + $0x149] sm:$0xff]  ;;  %562 = vst.msk [vmem:[#allocation2 + $0x210] sm:$0xff] %vm530_vm1, %v528_v2 }
 0x139   : > { %v1123_v56 = vpop.permute.xlu0 %1122 }
 0x13a   : > { %v1125_v1 = vpop.permute.xlu1 %1124  ;;  %1207 = vst.msk [vmem:[#allocation3 + $0x60] sm:$0xff] %vm1194_vm5, %v1123_v56  ;;  %v2017_v56 = vld [vmem:[#allocation2 + $0x151] sm:$0xff] }
 0x13b   : > { %1208 = vst.msk [vmem:[#allocation3 + $0x68] sm:$0xff] %vm1194_vm5, %v1125_v1  ;;  %1504 = vrot.lane.b32.xlu0 %v3680_v18, %s3256_s29  ;;  %v1818_v18 = vld [vmem:[#allocation2 + $0xf0] sm:$0xff] }
 0x13c   : > { %2082 = vrot.lane.b32.xlu1 %v3678_v17, %s3259_s10 }
 0x13d   : > { %v1127_v24 = vpop.permute.xlu0 %1126 }
 0x13e   : > { %v1129_v23 = vpop.permute.xlu1 %1128  ;;  %1209 = vst.msk [vmem:[#allocation3 + $0x70] sm:$0xff] %vm1194_vm5, %v1127_v24 }
 0x13f   : > { %1210 = vst.msk [vmem:[#allocation3 + $0x78] sm:$0xff] %vm1194_vm5, %v1129_v23  ;;  %1506 = vrot.lane.b32.xlu0 %v3678_v17, %s3256_s29 }
 0x140   : > { %1698 = vrot.lane.b32.xlu1 %v3570_v4, %s3257_s8 }
 0x141   : > { %v1131_v26 = vpop.permute.xlu0 %1130 }
 0x142   : > { %v1133_v25 = vpop.permute.xlu1 %1132  ;;  %1211 = vst.msk [vmem:[#allocation3 + $0x80] sm:$0xff] %vm1194_vm5, %v1131_v26 }
 0x143   : > { %1212 = vst.msk [vmem:[#allocation3 + $0x88] sm:$0xff] %vm1194_vm5, %v1133_v25  ;;  %1700 = vrot.lane.b32.xlu0 %v3560_v3, %s3257_s8 }
 0x144   : > { %1891 = vrot.lane.b32.xlu1 %v1817_v27, %s3258_s15 }
 0x145   : > { %v1135_v31 = vpop.permute.xlu0 %1134 }
 0x146   : > { %v1292_v34 = vpop.permute.xlu1 %1291  ;;  %1213 = vst.msk [vmem:[#allocation3 + $0x90] sm:$0xff] %vm1194_vm5, %v1135_v31 }
 0x147   : > { %1388 = vst.msk [vmem:[#allocation3] sm:$0xff] %vm1387_vm6, %v1292_v34  ;;  %1315 = vrot.lane.b32.xlu0 %v1817_v27, %s3255_s5 }
 0x148   : > { %1893 = vrot.lane.b32.xlu1 %v1818_v18, %s3258_s15 }
 0x149   : > { %v1294_v17 = vpop.permute.xlu0 %1293 }
 0x14a   : > { %v1485_v4 = vpop.permute.xlu1 %1484  ;;  %1389 = vst.msk [vmem:[#allocation3 + $0x8] sm:$0xff] %vm1387_vm6, %v1294_v17 }
 0x14b   : > { %1581 = vst.msk [vmem:[#allocation3] sm:$0xff] %vm1580_vm7, %v1485_v4  ;;  %2084 = vrot.lane.b32.xlu0 %v3688_v20, %s3259_s10 }
 0x14c   : > { %1317 = vrot.lane.b32.xlu1 %v1818_v18, %s3255_s5  ;;  %v1825_v18 = vld [vmem:[#allocation2 + $0x168] sm:$0xff] }
 0x14d   : > { %v1487_v32 = vpop.permute.xlu0 %1486 }
 0x14e   : > { %v1679_v3 = vpop.permute.xlu1 %1678  ;;  %1582 = vst.msk [vmem:[#allocation3 + $0x8] sm:$0xff] %vm1580_vm7, %v1487_v32 }
 0x14f   : > { %1775 = vst.msk [vmem:[#allocation3] sm:$0xff] %vm1774_vm8, %v1679_v3  ;;  %1508 = vrot.lane.b32.xlu0 %v3688_v20, %s3256_s29  ;;  %v1820_v20 = vld [vmem:[#allocation2 + $0x110] sm:$0xff] }
 0x150   : > { %2086 = vrot.lane.b32.xlu1 %v3686_v19, %s3259_s10 }
 0x151   : > { %v1681_v35 = vpop.permute.xlu0 %1680 }
 0x152   : > { %v1872_v55 = vpop.permute.xlu1 %1871  ;;  %1776 = vst.msk [vmem:[#allocation3 + $0x8] sm:$0xff] %vm1774_vm8, %v1681_v35  ;;  %v1826_v35 = vld [vmem:[#allocation2 + $0x170] sm:$0xff] }
 0x153   : > { %1968 = vst.msk [vmem:[#allocation3] sm:$0xff] %vm1967_vm9, %v1872_v55  ;;  %1510 = vrot.lane.b32.xlu0 %v3686_v19, %s3256_s29 }
 0x154   : > { %1702 = vrot.lane.b32.xlu1 %v3574_v6, %s3257_s8 }
 0x155   : > { %v1296_v57 = vpop.permute.xlu0 %1295 }
 0x156   : > { %v1874_v54 = vpop.permute.xlu1 %1873  ;;  %1390 = vst.msk [vmem:[#allocation3 + $0x10] sm:$0xff] %vm1387_vm6, %v1296_v57 }
 0x157   : > { %1969 = vst.msk [vmem:[#allocation3 + $0x8] sm:$0xff] %vm1967_vm9, %v1874_v54  ;;  %1704 = vrot.lane.b32.xlu0 %v3572_v5, %s3257_s8 }
 0x158   : > { %1895 = vrot.lane.b32.xlu1 %v1819_v51, %s3258_s15 }
 0x159   : > { %v2065_v29 = vpop.permute.xlu0 %2064 }
 0x15a   : > { %v1298_v37 = vpop.permute.xlu1 %1297  ;;  %2161 = vst.msk [vmem:[#allocation3] sm:$0xff] %vm2160_vm10, %v2065_v29 }
 0x15b   : > { %1391 = vst.msk [vmem:[#allocation3 + $0x18] sm:$0xff] %vm1387_vm6, %v1298_v37  ;;  %1319 = vrot.lane.b32.xlu0 %v1819_v51, %s3255_s5  ;;  %v2018_v51 = vld [vmem:[#allocation2 + $0x169] sm:$0xff] }
 0x15c   : > { %1897 = vrot.lane.b32.xlu1 %v1820_v20, %s3258_s15 }
 0x15d   : > { %v1489_v19 = vpop.permute.xlu0 %1488 }
 0x15e   : > { %v2067_v6 = vpop.permute.xlu1 %2066  ;;  %1583 = vst.msk [vmem:[#allocation3 + $0x10] sm:$0xff] %vm1580_vm7, %v1489_v19 }
 0x15f   : > { %2162 = vst.msk [vmem:[#allocation3 + $0x8] sm:$0xff] %vm2160_vm10, %v2067_v6  ;;  %2088 = vrot.lane.b32.xlu0 %v3696_v22, %s3259_s10  ;;  %v2019_v6 = vld [vmem:[#allocation2 + $0x171] sm:$0xff] }
 0x160   : > { %1321 = vrot.lane.b32.xlu1 %v1820_v20, %s3255_s5 }
 0x161   : > { %v1491_v38 = vpop.permute.xlu0 %1490  ;;  %v2193_v36 = vld [vmem:[#allocation3] sm:$0xff] }
 0x162   : > { %v1683_v5 = vpop.permute.xlu1 %1682  ;;  %1584 = vst.msk [vmem:[#allocation3 + $0x18] sm:$0xff] %vm1580_vm7, %v1491_v38  ;;  %3053 = vmatprep.mubr.msk.f32.mxu0 %vm2229_vm11, %v2193_v36 }
 0x163   : > { %1777 = vst.msk [vmem:[#allocation3 + $0x10] sm:$0xff] %vm1774_vm8, %v1683_v5  ;;  %1512 = vrot.lane.b32.xlu0 %v3696_v22, %s3256_s29  ;;  %v1822_v22 = vld [vmem:[#allocation2 + $0x130] sm:$0xff] }
 0x164   : > { %2090 = vrot.lane.b32.xlu1 %v3694_v21, %s3259_s10 }
 0x165   : > { %v1685_v40 = vpop.permute.xlu0 %1684 }
 0x166   : > { %v1876_v60 = vpop.permute.xlu1 %1875  ;;  %v2194_v53 = vld [vmem:[#allocation3 + $0x8] sm:$0xff]  ;;  %1778 = vst.msk [vmem:[#allocation3 + $0x18] sm:$0xff] %vm1774_vm8, %v1685_v40 }
 0x167   : > { %1970 = vst.msk [vmem:[#allocation3 + $0x10] sm:$0xff] %vm1967_vm9, %v1876_v60  ;;  %3054 = vmatmul.mubr.msk.f32.vlgmr.msra.gmra.mxu0 %vm2229_vm11, %v2194_v53  ;;  %1514 = vrot.lane.b32.xlu0 %v1435_v39, %s3256_s29  ;;  %v1827_v39 = vld [vmem:[#allocation2 + $0x188] sm:$0xff] }
 0x168   : > { %1706 = vrot.lane.b32.xlu1 %v3584_v8, %s3257_s8  ;;  %v2014_v8 = vld [vmem:[#allocation2 + $0x129] sm:$0xff] }
 0x169   : > { %v1300_v59 = vpop.permute.xlu0 %1299 }
 0x16a   : > { %v1878_v21 = vpop.permute.xlu1 %1877  ;;  %1392 = vst.msk [vmem:[#allocation3 + $0x20] sm:$0xff] %vm1387_vm6, %v1300_v59  ;;  %v2020_v59 = vld [vmem:[#allocation2 + $0x189] sm:$0xff] }
 0x16b   : > { %1971 = vst.msk [vmem:[#allocation3 + $0x18] sm:$0xff] %vm1967_vm9, %v1878_v21  ;;  %1708 = vrot.lane.b32.xlu0 %v3582_v7, %s3257_s8  ;;  %v2015_v7 = vld [vmem:[#allocation2 + $0x131] sm:$0xff] }
 0x16c   : > { %1899 = vrot.lane.b32.xlu1 %v1821_v58, %s3258_s15 }
 0x16d   : > { %v2069_v33 = vpop.permute.xlu0 %2068 }
 0x16e   : > { %v1302_v41 = vpop.permute.xlu1 %1301  ;;  %2163 = vst.msk [vmem:[#allocation3 + $0x10] sm:$0xff] %vm2160_vm10, %v2069_v33 }
 0x16f   : > { %1393 = vst.msk [vmem:[#allocation3 + $0x28] sm:$0xff] %vm1387_vm6, %v1302_v41  ;;  %1323 = vrot.lane.b32.xlu0 %v1821_v58, %s3255_s5 }
 0x170   : > { %1901 = vrot.lane.b32.xlu1 %v1822_v22, %s3258_s15 }
 0x171   : > { %v1493_v43 = vpop.permute.xlu0 %1492 }
 0x172   : > { %v2071_v50 = vpop.permute.xlu1 %2070  ;;  %1585 = vst.msk [vmem:[#allocation3 + $0x20] sm:$0xff] %vm1580_vm7, %v1493_v43 }
 0x173   : > { %2164 = vst.msk [vmem:[#allocation3 + $0x18] sm:$0xff] %vm2160_vm10, %v2071_v50  ;;  %2092 = vrot.lane.b32.xlu0 %v2014_v8, %s3259_s10 }
 0x174   : > { %1325 = vrot.lane.b32.xlu1 %v1822_v22, %s3255_s5 }
 0x175   : > { %v1495_v0 = vpop.permute.xlu0 %1494  ;;  %v2195_v28 = vld [vmem:[#allocation3 + $0x10] sm:$0xff] }
 0x176   : > { %v1687_v52 = vpop.permute.xlu1 %1686  ;;  %1586 = vst.msk [vmem:[#allocation3 + $0x28] sm:$0xff] %vm1580_vm7, %v1495_v0  ;;  %3056 = vmatprep.mubr.msk.f32.mxu0 %vm2229_vm11, %v2195_v28 }
 0x177   : > { %1779 = vst.msk [vmem:[#allocation3 + $0x20] sm:$0xff] %vm1774_vm8, %v1687_v52  ;;  %1516 = vrot.lane.b32.xlu0 %v2014_v8, %s3256_s29  ;;  %v1636_v52 = vld [vmem:[#allocation2 + $0x1a7] sm:$0xff] }
 0x178   : > { %2094 = vrot.lane.b32.xlu1 %v2015_v7, %s3259_s10 }
 0x179   : > { %v1689_v63 = vpop.permute.xlu0 %1688 }
 0x17a   : > { %v1880_v62 = vpop.permute.xlu1 %1879  ;;  %v2196_v61 = vld [vmem:[#allocation3 + $0x18] sm:$0xff]  ;;  %1780 = vst.msk [vmem:[#allocation3 + $0x28] sm:$0xff] %vm1774_vm8, %v1689_v63  ;;  %v1829_v63 = vld [vmem:[#allocation2 + $0x1a8] sm:$0xff] }
 0x17b   : > { %1972 = vst.msk [vmem:[#allocation3 + $0x20] sm:$0xff] %vm1967_vm9, %v1880_v62  ;;  %3057 = vmatmul.mubr.msk.f32.gmra.mxu0 %vm2229_vm11, %v2196_v61  ;;  %1518 = vrot.lane.b32.xlu0 %v2015_v7, %s3256_s29  ;;  %v1637_v62 = vld [vmem:[#allocation2 + $0x1af] sm:$0xff] }
 0x17c   : > { %1710 = vrot.lane.b32.xlu1 %v3594_v10, %s3257_s8  ;;  %v527_v10 = vld [vmem:[%s3402_s17 + $0xf0] sm:$0xff]  ;;  %s3006_s17 = sadd.s32 240, %s3396_s14  ;;  %s401_s14 = sand.u32 1, %s3233_s25  }
 0x17d   : > { %v1304_v48 = vpop.permute.xlu0 %1303  ;;  %561 = vst.msk [vmem:[#allocation2 + $0x208] sm:$0xff] %vm530_vm1, %v527_v10  ;;  %s444_s18 = scalar_lea.vmem %s4492_s2, %s3006_s17  ;;  %v1830_v10 = vld [vmem:[#allocation2 + $0x1b0] sm:$0xff]  ;;  %s2773_s17 = scalar_lea.sflag [#allocation5], %s401_s14 }
 0x17e   : > { %v1882_v46 = vpop.permute.xlu1 %1881  ;;  %1394 = vst.msk [vmem:[#allocation3 + $0x30] sm:$0xff] %vm1387_vm6, %v1304_v48  ;;  %v573_v4 = vld [vmem:[%s444_s18] sm:$0xff]  ;;  %v574_v32 = vld [vmem:[%s444_s18 + $0x8] sm:$0xff] }
 0x17f   : > { %1973 = vst.msk [vmem:[#allocation3 + $0x28] sm:$0xff] %vm1967_vm9, %v1882_v46  ;;  %1712 = vrot.lane.b32.xlu0 %v3586_v9, %s3257_s8  ;;  %v579_v3 = vmul.f32 0.0, %v573_v4  ;;  %v580_v55 = vmul.f32 0.0, %v574_v32 }
 0x180   : > { %1903 = vrot.lane.b32.xlu1 %v1823_v42, %s3258_s15 }
 0x181   : > { %v2073_v30 = vpop.permute.xlu0 %2072  ;;  %582 = vst.msk [vmem:[#allocation2 + $0x228] sm:$0xff] %vm530_vm1, %v579_v3  ;;  %583 = vst.msk [vmem:[#allocation2 + $0x230] sm:$0xff] %vm530_vm1, %v580_v55  ;;  %v2024_v3 = vld [vmem:[#allocation2 + $0x1c9] sm:$0xff] }
 0x182   : > { %v1306_v45 = vpop.permute.xlu1 %1305  ;;  %2165 = vst.msk [vmem:[#allocation3 + $0x20] sm:$0xff] %vm2160_vm10, %v2073_v30 }
 0x183   : > { %1395 = vst.msk [vmem:[#allocation3 + $0x38] sm:$0xff] %vm1387_vm6, %v1306_v45  ;;  %1136 = vrot.lane.b32.xlu0 %v3586_v9, %s3254_s23 }
 0x184   : > { %1327 = vrot.lane.b32.xlu1 %v1823_v42, %s3255_s5 }
 0x185   : > { %v1497_v44 = vpop.permute.xlu0 %1496 }
 0x186   : > { %v2075_v47 = vpop.permute.xlu1 %2074  ;;  %1587 = vst.msk [vmem:[#allocation3 + $0x30] sm:$0xff] %vm1580_vm7, %v1497_v44 }
 0x187   : > { %2166 = vst.msk [vmem:[#allocation3 + $0x28] sm:$0xff] %vm2160_vm10, %v2075_v47  ;;  %1905 = vrot.lane.b32.xlu0 %v1824_v49, %s3258_s15 }
 0x188   : > { %2096 = vrot.lane.b32.xlu1 %v2016_v15, %s3259_s10 }
 0x189   : > { %v1499_v14 = vpop.permute.xlu0 %1498  ;;  %v2197_v1 = vld [vmem:[#allocation3 + $0x20] sm:$0xff] }
 0x18a   : > { %v1691_v9 = vpop.permute.xlu1 %1690  ;;  %1588 = vst.msk [vmem:[#allocation3 + $0x38] sm:$0xff] %vm1580_vm7, %v1499_v14  ;;  %3059 = vmatprep.mubr.msk.f32.mxu0 %vm2229_vm11, %v2197_v1 }
 0x18b   : > { %1781 = vst.msk [vmem:[#allocation3 + $0x30] sm:$0xff] %vm1774_vm8, %v1691_v9  ;;  %1329 = vrot.lane.b32.xlu0 %v1824_v49, %s3255_s5  ;;  %v2022_v49 = vld [vmem:[#allocation2 + $0x1a9] sm:$0xff]  ;;  %v2023_v9 = vld [vmem:[#allocation2 + $0x1b1] sm:$0xff] }
 0x18c   : > { %1520 = vrot.lane.b32.xlu1 %v2016_v15, %s3256_s29 }
 0x18d   : > { %v1693_v24 = vpop.permute.xlu0 %1692 }
 0x18e   : > { %v1884_v23 = vpop.permute.xlu1 %1883  ;;  %v2198_v27 = vld [vmem:[#allocation3 + $0x28] sm:$0xff]  ;;  %1782 = vst.msk [vmem:[#allocation3 + $0x38] sm:$0xff] %vm1774_vm8, %v1693_v24 }
 0x18f   : > { %1974 = vst.msk [vmem:[#allocation3 + $0x30] sm:$0xff] %vm1967_vm9, %v1884_v23  ;;  %3060 = vmatmul.mubr.msk.f32.gmra.mxu0 %vm2229_vm11, %v2198_v27  ;;  %2098 = vrot.lane.b32.xlu0 %v2017_v56, %s3259_s10 }
 0x190   : > { %1522 = vrot.lane.b32.xlu1 %v2017_v56, %s3256_s29  ;;  %v1638_v56 = vld [vmem:[#allocation2 + $0x1c7] sm:$0xff] }
 0x191   : > { %v1308_v26 = vpop.permute.xlu0 %1307 }
 0x192   : > { %v1886_v25 = vpop.permute.xlu1 %1885  ;;  %1396 = vst.msk [vmem:[#allocation3 + $0x40] sm:$0xff] %vm1387_vm6, %v1308_v26  ;;  %v1831_v26 = vld [vmem:[#allocation2 + $0x1c8] sm:$0xff] }
 0x193   : > { %1975 = vst.msk [vmem:[#allocation3 + $0x38] sm:$0xff] %vm1967_vm9, %v1886_v25  ;;  %1714 = vrot.lane.b32.xlu0 %v3598_v12, %s3257_s8  ;;  %v1639_v25 = vld [vmem:[#allocation2 + $0x1cf] sm:$0xff] }
 0x194   : > { %1138 = vrot.lane.b32.xlu1 %v3598_v12, %s3254_s23 }
 0x195   : > { %v2077_v31 = vpop.permute.xlu0 %2076 }
 0x196   : > { %v1310_v34 = vpop.permute.xlu1 %1309  ;;  %2167 = vst.msk [vmem:[#allocation3 + $0x30] sm:$0xff] %vm2160_vm10, %v2077_v31 }
 0x197   : > { %1397 = vst.msk [vmem:[#allocation3 + $0x48] sm:$0xff] %vm1387_vm6, %v1310_v34  ;;  %1716 = vrot.lane.b32.xlu0 %v3596_v11, %s3257_s8 }
 0x198   : > { %1907 = vrot.lane.b32.xlu1 %v1825_v18, %s3258_s15 }
 0x199   : > { %v1501_v12 = vpop.permute.xlu0 %1500 }
 0x19a   : > { %v2079_v17 = vpop.permute.xlu1 %2078  ;;  %1589 = vst.msk [vmem:[#allocation3 + $0x40] sm:$0xff] %vm1580_vm7, %v1501_v12  ;;  %v1832_v12 = vld [vmem:[#allocation2 + $0x1d0] sm:$0xff] }
 0x19b   : > { %2168 = vst.msk [vmem:[#allocation3 + $0x38] sm:$0xff] %vm2160_vm10, %v2079_v17  ;;  %1140 = vrot.lane.b32.xlu0 %v3596_v11, %s3254_s23 }
 0x19c   : > { %1331 = vrot.lane.b32.xlu1 %v1825_v18, %s3255_s5 }
 0x19d   : > { %v1503_v57 = vpop.permute.xlu0 %1502  ;;  %v2199_v20 = vld [vmem:[#allocation3 + $0x30] sm:$0xff] }
 0x19e   : > { %v1695_v54 = vpop.permute.xlu1 %1694  ;;  %1590 = vst.msk [vmem:[#allocation3 + $0x48] sm:$0xff] %vm1580_vm7, %v1503_v57  ;;  %3062 = vmatprep.mubr.msk.f32.mxu0 %vm2229_vm11, %v2199_v20 }
 0x19f   : > { %1783 = vst.msk [vmem:[#allocation3 + $0x40] sm:$0xff] %vm1774_vm8, %v1695_v54  ;;  %1909 = vrot.lane.b32.xlu0 %v1826_v35, %s3258_s15  ;;  %v2025_v54 = vld [vmem:[#allocation2 + $0x1d1] sm:$0xff] }
 0x1a0   : > { %2100 = vrot.lane.b32.xlu1 %v2018_v51, %s3259_s10 }
 0x1a1   : > { %v1697_v37 = vpop.permute.xlu0 %1696 }
 0x1a2   : > { %v1888_v11 = vpop.permute.xlu1 %1887  ;;  %v2200_v29 = vld [vmem:[#allocation3 + $0x38] sm:$0xff]  ;;  %1784 = vst.msk [vmem:[#allocation3 + $0x48] sm:$0xff] %vm1774_vm8, %v1697_v37  ;;  %v1640_v37 = vld [vmem:[#allocation2 + $0x1e7] sm:$0xff] }
 0x1a3   : > { %1976 = vst.msk [vmem:[#allocation3 + $0x40] sm:$0xff] %vm1967_vm9, %v1888_v11  ;;  %3063 = vmatmul.mubr.msk.f32.gmra.mxu0 %vm2229_vm11, %v2200_v29  ;;  %1333 = vrot.lane.b32.xlu0 %v1826_v35, %s3255_s5 }
 0x1a4   : > { %1524 = vrot.lane.b32.xlu1 %v2018_v51, %s3256_s29 }
 0x1a5   : > { %v1312_v5 = vpop.permute.xlu0 %1311 }
 0x1a6   : > { %v1890_v19 = vpop.permute.xlu1 %1889  ;;  %1398 = vst.msk [vmem:[#allocation3 + $0x50] sm:$0xff] %vm1387_vm6, %v1312_v5  ;;  %v1641_v5 = vld [vmem:[#allocation2 + $0x1ef] sm:$0xff] }
 0x1a7   : > { %1977 = vst.msk [vmem:[#allocation3 + $0x48] sm:$0xff] %vm1967_vm9, %v1890_v19  ;;  %2102 = vrot.lane.b32.xlu0 %v2019_v6, %s3259_s10 }
 0x1a8   : > { %1526 = vrot.lane.b32.xlu1 %v2019_v6, %s3256_s29 }
 0x1a9   : > { %v2081_v36 = vpop.permute.xlu0 %2080 }
 0x1aa   : > { %v1314_v38 = vpop.permute.xlu1 %1313  ;;  %2169 = vst.msk [vmem:[#allocation3 + $0x40] sm:$0xff] %vm2160_vm10, %v2081_v36 }
 0x1ab   : > { %1399 = vst.msk [vmem:[#allocation3 + $0x58] sm:$0xff] %vm1387_vm6, %v1314_v38  ;;  %1718 = vrot.lane.b32.xlu0 %v3612_v16, %s3257_s8  ;;  %v1833_v38 = vld [vmem:[#allocation2 + $0x1e8] sm:$0xff] }
 0x1ac   : > { %1142 = vrot.lane.b32.xlu1 %v3612_v16, %s3254_s23  ;;  %v1828_v16 = vld [vmem:[#allocation2 + $0x190] sm:$0xff] }
 0x1ad   : > { %v1505_v40 = vpop.permute.xlu0 %1504 }
 0x1ae   : > { %v2083_v60 = vpop.permute.xlu1 %2082  ;;  %1591 = vst.msk [vmem:[#allocation3 + $0x50] sm:$0xff] %vm1580_vm7, %v1505_v40 }
 0x1af   : > { %2170 = vst.msk [vmem:[#allocation3 + $0x48] sm:$0xff] %vm2160_vm10, %v2083_v60  ;;  %1720 = vrot.lane.b32.xlu0 %v3608_v13, %s3257_s8 }
 0x1b0   : > { %1911 = vrot.lane.b32.xlu1 %v1827_v39, %s3258_s15 }
 0x1b1   : > { %v1507_v58 = vpop.permute.xlu0 %1506  ;;  %v2201_v21 = vld [vmem:[#allocation3 + $0x40] sm:$0xff] }
 0x1b2   : > { %v1699_v53 = vpop.permute.xlu1 %1698  ;;  %1592 = vst.msk [vmem:[#allocation3 + $0x58] sm:$0xff] %vm1580_vm7, %v1507_v58  ;;  %3065 = vmatprep.mubr.msk.f32.mxu0 %vm2229_vm11, %v2201_v21  ;;  %v2026_v58 = vld [vmem:[#allocation2 + $0x1e9] sm:$0xff] }
 0x1b3   : > { %1785 = vst.msk [vmem:[#allocation3 + $0x50] sm:$0xff] %vm1774_vm8, %v1699_v53  ;;  %1144 = vrot.lane.b32.xlu0 %v3608_v13, %s3254_s23  ;;  %v2021_v13 = vld [vmem:[#allocation2 + $0x191] sm:$0xff] }
 0x1b4   : > { %1335 = vrot.lane.b32.xlu1 %v1827_v39, %s3255_s5  ;;  %v1834_v53 = vld [vmem:[#allocation2 + $0x1f0] sm:$0xff] }
 0x1b5   : > { %v1701_v41 = vpop.permute.xlu0 %1700 }
 0x1b6   : > { %v1892_v22 = vpop.permute.xlu1 %1891  ;;  %v2202_v33 = vld [vmem:[#allocation3 + $0x48] sm:$0xff]  ;;  %1786 = vst.msk [vmem:[#allocation3 + $0x58] sm:$0xff] %vm1774_vm8, %v1701_v41 }
 0x1b7   : > { %1978 = vst.msk [vmem:[#allocation3 + $0x50] sm:$0xff] %vm1967_vm9, %v1892_v22  ;;  %3066 = vmatmul.mubr.msk.f32.gmra.mxu0 %vm2229_vm11, %v2202_v33  ;;  %1913 = vrot.lane.b32.xlu0 %v1828_v16, %s3258_s15  ;;  %v2027_v33 = vld [vmem:[#allocation2 + $0x1f1] sm:$0xff] }
 0x1b8   : > { %2104 = vrot.lane.b32.xlu1 %v2020_v59, %s3259_s10 }
 0x1b9   : > { %v1316_v50 = vpop.permute.xlu0 %1315 }
 0x1ba   : > { %v1894_v8 = vpop.permute.xlu1 %1893  ;;  %1400 = vst.msk [vmem:[#allocation3 + $0x60] sm:$0xff] %vm1387_vm6, %v1316_v50 }
 0x1bb   : > { %1979 = vst.msk [vmem:[#allocation3 + $0x58] sm:$0xff] %vm1967_vm9, %v1894_v8  ;;  %1337 = vrot.lane.b32.xlu0 %v1828_v16, %s3255_s5 }
 0x1bc   : > { %1528 = vrot.lane.b32.xlu1 %v2020_v59, %s3256_s29 }
 0x1bd   : > { %v2085_v7 = vpop.permute.xlu0 %2084 }
 0x1be   : > { %v1318_v43 = vpop.permute.xlu1 %1317  ;;  %2171 = vst.msk [vmem:[#allocation3 + $0x50] sm:$0xff] %vm2160_vm10, %v2085_v7 }
 0x1bf   : > { %1401 = vst.msk [vmem:[#allocation3 + $0x68] sm:$0xff] %vm1387_vm6, %v1318_v43  ;;  %2106 = vrot.lane.b32.xlu0 %v2021_v13, %s3259_s10 }
 0x1c0   : > { %1530 = vrot.lane.b32.xlu1 %v2021_v13, %s3256_s29  ;;  %v1642_v13 = vld [vmem:[#allocation2 + $0x207] sm:$0xff] }
 0x1c1   : > { %v1509_v28 = vpop.permute.xlu0 %1508 }
 0x1c2   : > { %v2087_v0 = vpop.permute.xlu1 %2086  ;;  %1593 = vst.msk [vmem:[#allocation3 + $0x60] sm:$0xff] %vm1580_vm7, %v1509_v28  ;;  %v1835_v28 = vld [vmem:[#allocation2 + $0x208] sm:$0xff] }
 0x1c3   : > { %2172 = vst.msk [vmem:[#allocation3 + $0x58] sm:$0xff] %vm2160_vm10, %v2087_v0  ;;  %1722 = vrot.lane.b32.xlu0 %v1636_v52, %s3257_s8  ;;  %v1643_v0 = vld [vmem:[#allocation2 + $0x20f] sm:$0xff] }
 0x1c4   : > { %1146 = vrot.lane.b32.xlu1 %v1636_v52, %s3254_s23 }
 0x1c5   : > { %v1511_v42 = vpop.permute.xlu0 %1510  ;;  %v2203_v46 = vld [vmem:[#allocation3 + $0x50] sm:$0xff] }
 0x1c6   : > { %v1703_v61 = vpop.permute.xlu1 %1702  ;;  %1594 = vst.msk [vmem:[#allocation3 + $0x68] sm:$0xff] %vm1580_vm7, %v1511_v42  ;;  %3068 = vmatprep.mubr.msk.f32.mxu0 %vm2229_vm11, %v2203_v46  ;;  %v1836_v46 = vld [vmem:[#allocation2 + $0x210] sm:$0xff] }
 0x1c7   : > { %1787 = vst.msk [vmem:[#allocation3 + $0x60] sm:$0xff] %vm1774_vm8, %v1703_v61  ;;  %1724 = vrot.lane.b32.xlu0 %v1637_v62, %s3257_s8 }
 0x1c8   : > { %1915 = vrot.lane.b32.xlu1 %v1829_v63, %s3258_s15 }
 0x1c9   : > { %v1705_v45 = vpop.permute.xlu0 %1704 }
 0x1ca   : > { %v1896_v48 = vpop.permute.xlu1 %1895  ;;  %v2204_v30 = vld [vmem:[#allocation3 + $0x58] sm:$0xff]  ;;  %1788 = vst.msk [vmem:[#allocation3 + $0x68] sm:$0xff] %vm1774_vm8, %v1705_v45 }
 0x1cb   : > { %1980 = vst.msk [vmem:[#allocation3 + $0x60] sm:$0xff] %vm1967_vm9, %v1896_v48  ;;  %3069 = vmatmul.mubr.msk.f32.gmra.mxu0 %vm2229_vm11, %v2204_v30  ;;  %1148 = vrot.lane.b32.xlu0 %v1637_v62, %s3254_s23  ;;  %v2028_v48 = vld [vmem:[#allocation2 + $0x209] sm:$0xff] }
 0x1cc   : > { %1339 = vrot.lane.b32.xlu1 %v1829_v63, %s3255_s5 }
 0x1cd   : > { %v1320_v47 = vpop.permute.xlu0 %1319 }
 0x1ce   : > { %v1898_v15 = vpop.permute.xlu1 %1897  ;;  %1402 = vst.msk [vmem:[#allocation3 + $0x70] sm:$0xff] %vm1387_vm6, %v1320_v47  ;;  %v2029_v47 = vld [vmem:[#allocation2 + $0x211] sm:$0xff] }
 0x1cf   : > { %1981 = vst.msk [vmem:[#allocation3 + $0x68] sm:$0xff] %vm1967_vm9, %v1898_v15  ;;  %1917 = vrot.lane.b32.xlu0 %v1830_v10, %s3258_s15 }
 0x1d0   : > { %2108 = vrot.lane.b32.xlu1 %v2022_v49, %s3259_s10 }
 0x1d1   : > { %v2089_v2 = vpop.permute.xlu0 %2088 }
 0x1d2   : > { %v1322_v44 = vpop.permute.xlu1 %1321  ;;  %2173 = vst.msk [vmem:[#allocation3 + $0x60] sm:$0xff] %vm2160_vm10, %v2089_v2 }
 0x1d3   : > { %1403 = vst.msk [vmem:[#allocation3 + $0x78] sm:$0xff] %vm1387_vm6, %v1322_v44  ;;  %1341 = vrot.lane.b32.xlu0 %v1830_v10, %s3255_s5 }
 0x1d4   : > { %1532 = vrot.lane.b32.xlu1 %v2022_v49, %s3256_s29 }
 0x1d5   : > { %v1513_v1 = vpop.permute.xlu0 %1512 }
 0x1d6   : > { %v2091_v14 = vpop.permute.xlu1 %2090  ;;  %1595 = vst.msk [vmem:[#allocation3 + $0x70] sm:$0xff] %vm1580_vm7, %v1513_v1 }
 0x1d7   : > { %2174 = vst.msk [vmem:[#allocation3 + $0x68] sm:$0xff] %vm2160_vm10, %v2091_v14  ;;  %2110 = vrot.lane.b32.xlu0 %v2023_v9, %s3259_s10  ;;  %v1645_v14 = vld [vmem:[#allocation2 + $0x22f] sm:$0xff] }
 0x1d8   : > { %1534 = vrot.lane.b32.xlu1 %v2023_v9, %s3256_s29  ;;  %v1644_v9 = vld [vmem:[#allocation2 + $0x227] sm:$0xff] }
 0x1d9   : > { %v1515_v24 = vpop.permute.xlu0 %1514  ;;  %v2205_v27 = vld [vmem:[#allocation3 + $0x60] sm:$0xff] }
 0x1da   : > { %v1707_v23 = vpop.permute.xlu1 %1706  ;;  %1596 = vst.msk [vmem:[#allocation3 + $0x78] sm:$0xff] %vm1580_vm7, %v1515_v24  ;;  %3071 = vmatprep.mubr.msk.f32.mxu0 %vm2229_vm11, %v2205_v27  ;;  %v1837_v24 = vld [vmem:[#allocation2 + $0x228] sm:$0xff]  ;;  %v1838_v27 = vld [vmem:[#allocation2 + $0x230] sm:$0xff] }
 0x1db   : > { %1789 = vst.msk [vmem:[#allocation3 + $0x70] sm:$0xff] %vm1774_vm8, %v1707_v23  ;;  %1726 = vrot.lane.b32.xlu0 %v1638_v56, %s3257_s8 }
 0x1dc   : > { %1150 = vrot.lane.b32.xlu1 %v1638_v56, %s3254_s23 }
 0x1dd   : > { %v1709_v34 = vpop.permute.xlu0 %1708 }
 0x1de   : > { %v1900_v18 = vpop.permute.xlu1 %1899  ;;  %v2206_v31 = vld [vmem:[#allocation3 + $0x68] sm:$0xff]  ;;  %1790 = vst.msk [vmem:[#allocation3 + $0x78] sm:$0xff] %vm1774_vm8, %v1709_v34 }
 0x1df   : > { %1982 = vst.msk [vmem:[#allocation3 + $0x70] sm:$0xff] %vm1967_vm9, %v1900_v18  ;;  %3072 = vmatmul.mubr.msk.f32.gmra.mxu0 %vm2229_vm11, %v2206_v31  ;;  %1728 = vrot.lane.b32.xlu0 %v1639_v25, %s3257_s8 }
 0x1e0   : > { %1919 = vrot.lane.b32.xlu1 %v1831_v26, %s3258_s15 }
 0x1e1   : > { %v1324_v17 = vpop.permute.xlu0 %1323 }
 0x1e2   : > { %v1902_v4 = vpop.permute.xlu1 %1901  ;;  %1404 = vst.msk [vmem:[#allocation3 + $0x80] sm:$0xff] %vm1387_vm6, %v1324_v17  ;;  %v2030_v17 = vld [vmem:[#allocation2 + $0x229] sm:$0xff] }
 0x1e3   : > { %1983 = vst.msk [vmem:[#allocation3 + $0x78] sm:$0xff] %vm1967_vm9, %v1902_v4  ;;  %1152 = vrot.lane.b32.xlu0 %v1639_v25, %s3254_s23 }
 0x1e4   : > { %1343 = vrot.lane.b32.xlu1 %v1831_v26, %s3255_s5 }
 0x1e5   : > { %v2093_v55 = vpop.permute.xlu0 %2092 }
 0x1e6   : > { %v1326_v32 = vpop.permute.xlu1 %1325  ;;  %2175 = vst.msk [vmem:[#allocation3 + $0x70] sm:$0xff] %vm2160_vm10, %v2093_v55 }
 0x1e7   : > { %1405 = vst.msk [vmem:[#allocation3 + $0x88] sm:$0xff] %vm1387_vm6, %v1326_v32  ;;  %1921 = vrot.lane.b32.xlu0 %v1832_v12, %s3258_s15 }
 0x1e8   : > { %2112 = vrot.lane.b32.xlu1 %v2024_v3, %s3259_s10 }
 0x1e9   : > { %v1517_v51 = vpop.permute.xlu0 %1516 }
 0x1ea   : > { %v2095_v35 = vpop.permute.xlu1 %2094  ;;  %1597 = vst.msk [vmem:[#allocation3 + $0x80] sm:$0xff] %vm1580_vm7, %v1517_v51 }
 0x1eb   : > { %2176 = vst.msk [vmem:[#allocation3 + $0x78] sm:$0xff] %vm2160_vm10, %v2095_v35  ;;  %1345 = vrot.lane.b32.xlu0 %v1832_v12, %s3255_s5  ;;  %v2031_v12 = vld [vmem:[#allocation2 + $0x231] sm:$0xff] }
 0x1ec   : > { %1536 = vrot.lane.b32.xlu1 %v2024_v3, %s3256_s29 }
 0x1ed   : > { %v1519_v57 = vpop.permute.xlu0 %1518  ;;  %v2207_v11 = vld [vmem:[#allocation3 + $0x70] sm:$0xff] }
 0x1ee   : > { %v1711_v20 = vpop.permute.xlu1 %1710  ;;  %1598 = vst.msk [vmem:[#allocation3 + $0x88] sm:$0xff] %vm1580_vm7, %v1519_v57  ;;  %3074 = vmatprep.mubr.msk.f32.mxu0 %vm2229_vm11, %v2207_v11 }
 0x1ef   : > { %1791 = vst.msk [vmem:[#allocation3 + $0x80] sm:$0xff] %vm1774_vm8, %v1711_v20  ;;  %2114 = vrot.lane.b32.xlu0 %v2025_v54, %s3259_s10 }
 0x1f0   : > { %1538 = vrot.lane.b32.xlu1 %v2025_v54, %s3256_s29 }
 0x1f1   : > { %v1713_v29 = vpop.permute.xlu0 %1712 }
 0x1f2   : > { %v1904_v6 = vpop.permute.xlu1 %1903  ;;  %v2208_v19 = vld [vmem:[#allocation3 + $0x78] sm:$0xff]  ;;  %1792 = vst.msk [vmem:[#allocation3 + $0x88] sm:$0xff] %vm1774_vm8, %v1713_v29 }
 0x1f3   : > { %1984 = vst.msk [vmem:[#allocation3 + $0x80] sm:$0xff] %vm1967_vm9, %v1904_v6  ;;  %3075 = vmatmul.mubr.msk.f32.gmra.mxu0 %vm2229_vm11, %v2208_v19  ;;  %1730 = vrot.lane.b32.xlu0 %v1640_v37, %s3257_s8 }
 0x1f4   : > { %1154 = vrot.lane.b32.xlu1 %v1640_v37, %s3254_s23 }
 0x1f5   : > { %v1137_v36 = vpop.permute.xlu0 %1136 }
 0x1f6   : > { %v1328_v39 = vpop.permute.xlu1 %1327  ;;  %1214 = vst.msk [vmem:[#allocation3 + $0x98] sm:$0xff] %vm1194_vm5, %v1137_v36 }
 0x1f7   : > { %1406 = vst.msk [vmem:[#allocation3 + $0x90] sm:$0xff] %vm1387_vm6, %v1328_v39  ;;  %1732 = vrot.lane.b32.xlu0 %v1641_v5, %s3257_s8 }
 0x1f8   : > { %1923 = vrot.lane.b32.xlu1 %v1833_v38, %s3258_s15 }
 0x1f9   : > { %v1906_v60 = vpop.permute.xlu0 %1905 }
 0x1fa   : > { %v2097_v40 = vpop.permute.xlu1 %2096  ;;  %1985 = vst.msk [vmem:[#allocation3 + $0x88] sm:$0xff] %vm1967_vm9, %v1906_v60 }
 0x1fb   : > { %2177 = vst.msk [vmem:[#allocation3 + $0x80] sm:$0xff] %vm2160_vm10, %v2097_v40  ;;  %1156 = vrot.lane.b32.xlu0 %v1641_v5, %s3254_s23 }
 0x1fc   : > { %1347 = vrot.lane.b32.xlu1 %v1833_v38, %s3255_s5 }
 0x1fd   : > { %v1330_v21 = vpop.permute.xlu0 %1329 }
 0x1fe   : > { %v1521_v16 = vpop.permute.xlu1 %1520  ;;  %1407 = vst.msk [vmem:[#allocation3 + $0x98] sm:$0xff] %vm1387_vm6, %v1330_v21 }
 0x1ff   : > { %1599 = vst.msk [vmem:[#allocation3 + $0x90] sm:$0xff] %vm1580_vm7, %v1521_v16  ;;  %1925 = vrot.lane.b32.xlu0 %v1834_v53, %s3258_s15 }
 0x200   : > { %2116 = vrot.lane.b32.xlu1 %v2026_v58, %s3259_s10 }
 0x201   : > { %v2099_v59 = vpop.permute.xlu0 %2098 }
 0x202   : > { %v1523_v22 = vpop.permute.xlu1 %1522  ;;  %v2209_v41 = vld [vmem:[#allocation3 + $0x80] sm:$0xff]  ;;  %2178 = vst.msk [vmem:[#allocation3 + $0x88] sm:$0xff] %vm2160_vm10, %v2099_v59 }
 0x203   : > { %1600 = vst.msk [vmem:[#allocation3 + $0x98] sm:$0xff] %vm1580_vm7, %v1523_v22  ;;  %3077 = vmatprep.mubr.msk.f32.mxu1 %vm2229_vm11, %v2209_v41  ;;  %1349 = vrot.lane.b32.xlu0 %v1834_v53, %s3255_s5 }
 0x204   : > { %1540 = vrot.lane.b32.xlu1 %v2026_v58, %s3256_s29 }
 0x205   : > { %v1715_v8 = vpop.permute.xlu0 %1714 }
 0x206   : > { %v1139_v50 = vpop.permute.xlu1 %1138  ;;  %1793 = vst.msk [vmem:[#allocation3 + $0x90] sm:$0xff] %vm1774_vm8, %v1715_v8 }
 0x207   : > { %1215 = vst.msk [vmem:[#allocation3 + $0xa0] sm:$0xff] %vm1194_vm5, %v1139_v50  ;;  %2118 = vrot.lane.b32.xlu0 %v2027_v33, %s3259_s10 }
 0x208   : > { %1542 = vrot.lane.b32.xlu1 %v2027_v33, %s3256_s29 }
 0x209   : > { %v1717_v43 = vpop.permute.xlu0 %1716  ;;  %v2210_v52 = vld [vmem:[#allocation3 + $0x88] sm:$0xff] }
 0x20a   : > { %v1908_v7 = vpop.permute.xlu1 %1907  ;;  %1794 = vst.msk [vmem:[#allocation3 + $0x98] sm:$0xff] %vm1774_vm8, %v1717_v43  ;;  %3078 = vmatmul.mubr.msk.f32.vlgmr.msra.gmra.mxu1 %vm2229_vm11, %v2210_v52 }
 0x20b   : > { %1986 = vst.msk [vmem:[#allocation3 + $0x90] sm:$0xff] %vm1967_vm9, %v1908_v7  ;;  %1734 = vrot.lane.b32.xlu0 %v1642_v13, %s3257_s8 }
 0x20c   : > { %1158 = vrot.lane.b32.xlu1 %v1642_v13, %s3254_s23 }
 0x20d   : > { %v1141_v62 = vpop.permute.xlu0 %1140 }
 0x20e   : > { %v1332_v63 = vpop.permute.xlu1 %1331  ;;  %1216 = vst.msk [vmem:[#allocation3 + $0xa8] sm:$0xff] %vm1194_vm5, %v1141_v62 }
 0x20f   : > { %1408 = vst.msk [vmem:[#allocation3 + $0xa0] sm:$0xff] %vm1387_vm6, %v1332_v63  ;;  %1736 = vrot.lane.b32.xlu0 %v1643_v0, %s3257_s8 }
 0x210   : > { %1927 = vrot.lane.b32.xlu1 %v1835_v28, %s3258_s15 }
 0x211   : > { %v1910_v61 = vpop.permute.xlu0 %1909 }
 0x212   : > { %v2101_v42 = vpop.permute.xlu1 %2100  ;;  %1987 = vst.msk [vmem:[#allocation3 + $0x98] sm:$0xff] %vm1967_vm9, %v1910_v61 }
 0x213   : > { %2179 = vst.msk [vmem:[#allocation3 + $0x90] sm:$0xff] %vm2160_vm10, %v2101_v42  ;;  %1160 = vrot.lane.b32.xlu0 %v1643_v0, %s3254_s23 }
 0x214   : > { %1351 = vrot.lane.b32.xlu1 %v1835_v28, %s3255_s5 }
 0x215   : > { %v1334_v45 = vpop.permute.xlu0 %1333 }
 0x216   : > { %v1525_v30 = vpop.permute.xlu1 %1524  ;;  %1409 = vst.msk [vmem:[#allocation3 + $0xa8] sm:$0xff] %vm1387_vm6, %v1334_v45 }
 0x217   : > { %1601 = vst.msk [vmem:[#allocation3 + $0xa0] sm:$0xff] %vm1580_vm7, %v1525_v30  ;;  %1929 = vrot.lane.b32.xlu0 %v1836_v46, %s3258_s15 }
 0x218   : > { %2120 = vrot.lane.b32.xlu1 %v2028_v48, %s3259_s10 }
 0x219   : > { %v2103_v10 = vpop.permute.xlu0 %2102 }
 0x21a   : > { %v1527_v49 = vpop.permute.xlu1 %1526  ;;  %v2211_v15 = vld [vmem:[#allocation3 + $0x90] sm:$0xff]  ;;  %2180 = vst.msk [vmem:[#allocation3 + $0x98] sm:$0xff] %vm2160_vm10, %v2103_v10 }
 0x21b   : > { %1602 = vst.msk [vmem:[#allocation3 + $0xa8] sm:$0xff] %vm1580_vm7, %v1527_v49  ;;  %3080 = vmatprep.mubr.msk.f32.mxu1 %vm2229_vm11, %v2211_v15  ;;  %1353 = vrot.lane.b32.xlu0 %v1836_v46, %s3255_s5 }
 0x21c   : > { %1544 = vrot.lane.b32.xlu1 %v2028_v48, %s3256_s29 }
 0x21d   : > { %v1719_v44 = vpop.permute.xlu0 %1718 }
 0x21e   : > { %v1143_v2 = vpop.permute.xlu1 %1142  ;;  %1795 = vst.msk [vmem:[#allocation3 + $0xa0] sm:$0xff] %vm1774_vm8, %v1719_v44 }
 0x21f   : > { %1217 = vst.msk [vmem:[#allocation3 + $0xb0] sm:$0xff] %vm1194_vm5, %v1143_v2  ;;  %2122 = vrot.lane.b32.xlu0 %v2029_v47, %s3259_s10 }
 0x220   : > { %1546 = vrot.lane.b32.xlu1 %v2029_v47, %s3256_s29  ;;  %s2957_s29 = sshll.u32 %s401_s14, 1 }
 0x221   : > { %v1721_v1 = vpop.permute.xlu0 %1720  ;;  %v2212_v23 = vld [vmem:[#allocation3 + $0x98] sm:$0xff] }
 0x222   : > { %v1912_v56 = vpop.permute.xlu1 %1911  ;;  %1796 = vst.msk [vmem:[#allocation3 + $0xa8] sm:$0xff] %vm1774_vm8, %v1721_v1  ;;  %3081 = vmatmul.mubr.msk.f32.gmra.mxu1 %vm2229_vm11, %v2212_v23 }
 0x223   : > { %1988 = vst.msk [vmem:[#allocation3 + $0xa0] sm:$0xff] %vm1967_vm9, %v1912_v56  ;;  %1738 = vrot.lane.b32.xlu0 %v1644_v9, %s3257_s8 }
 0x224   : > { %1740 = vrot.lane.b32.xlu1 %v1645_v14, %s3257_s8  ;;  %s3000_s8 = sshll.u32 %s3241_s27, 5  ;;  %s3260_s27 = smov [#allocation4]  }
 0x225   : > { %v1145_v25 = vpop.permute.xlu0 %1144  ;;  %s3177_s16 = sshll.u32 %s3260_s27, 4  ;;  %s3178_s16 = int_to_ptr.vmem [resolvable:$false] %s3177_s16 }
 0x226   : > { %v1336_v26 = vpop.permute.xlu1 %1335  ;;  %1218 = vst.msk [vmem:[#allocation3 + $0xb8] sm:$0xff] %vm1194_vm5, %v1145_v25  ;;  %s3179_s18 = scalar_lea.vmem %s3178_s16, 64 }
 0x227   : > { %1410 = vst.msk [vmem:[#allocation3 + $0xb0] sm:$0xff] %vm1387_vm6, %v1336_v26  ;;  %v3055_v18 = vpop.f32.mrf.mxu0  ;;  %1931 = vrot.lane.b32.xlu0 %v1837_v24, %s3258_s15 }
 0x228   : > { %2557 = vst.msk [vmem:[%s4237_s19 + $0x8] sm:$0xff] %vm2555_vm12, %v3055_v18  ;;  %v2589_v34 = vsel %vm2555_vm12, %v3055_v18, 0.0  ;;  %v2658_v31 = vmul.f32 %v3055_v18, %v3055_v18  ;;  %1933 = vrot.lane.b32.xlu1 %v1838_v27, %s3258_s15  ;;  %s403_s15 = scalar_lea.vmem [#allocation4], %s2957_s29 }
 0x229   : > { %v2396_v4 = vpop.f32.mrf.mxu0  ;;  %v1914_v35 = vpop.permute.xlu0 %1913  ;;  %s2791_s20 = sshll.u32 %s403_s15, 4  ;;  %s2792_s20 = int_to_ptr.vmem [resolvable:$true] %s2791_s20 }
 0x22a   : > { %v2690_v3 = vsel %vm2555_vm12, %v2658_v31, 0.0  ;;  %2556 = vst.msk [vmem:[%s4237_s19] sm:$0xff] %vm2555_vm12, %v2396_v4  ;;  %v2588_v32 = vsel %vm2555_vm12, %v2396_v4, 0.0  ;;  %v2657_v55 = vmul.f32 %v2396_v4, %v2396_v4  ;;  %v2105_v51 = vpop.permute.xlu1 %2104  ;;  %s3173_s13 = scalar_lea.vmem %s2792_s20, 32  ;;  %p3180_p1 = scmp.lt.s32.totalorder %s2792_s20, %s3178_s16 }
 0x22b   : > { %v2590_v54 = vadd.f32 %v2589_v34, %v2588_v32  ;;  %1989 = vst.msk [vmem:[#allocation3 + $0xa8] sm:$0xff] %vm1967_vm9, %v1914_v35  ;;  %2124 = vrot.lane.b32.xlu0 %v2030_v17, %s3259_s10  ;;  %p3174_p12 = scmp.ne.s32.totalorder %s2792_s20, %s3173_s13  ;;  %p3181_p2 = scmp.lt.s32.totalorder %s3179_s18, %s3173_s13 }
 0x22c   : > { %2181 = vst.msk [vmem:[#allocation3 + $0xa0] sm:$0xff] %vm2160_vm10, %v2105_v51  ;;  %v2689_v57 = vsel %vm2555_vm12, %v2657_v55, 0.0  ;;  %2126 = vrot.lane.b32.xlu1 %v2031_v12, %s3259_s10  ;;  %s4450_s10 = scalar_lea.hbm %s4497_s7, %s3000_s8 }
 0x22d   : > { %v2691_v20 = vadd.f32 %v2690_v3, %v2689_v57  ;;  %v1338_v11 = vpop.permute.xlu0 %1337  ;;  %p3175_p13 = pnand %p3174_p12, %p3341_p4  ;;  %p3182_p3 = por %p3181_p2, %p3180_p1 }
 0x22e   : > { %v1529_v37 = vpop.permute.xlu1 %1528  ;;  %1411 = vst.msk [vmem:[#allocation3 + $0xb8] sm:$0xff] %vm1387_vm6, %v1338_v11 }
 0x22f   : > { %1603 = vst.msk [vmem:[#allocation3 + $0xb0] sm:$0xff] %vm1580_vm7, %v1529_v37  ;;  %p3176_p0 = pneg %p3175_p13 }
 0x231   : > { %v2107_v29 = vpop.permute.xlu0 %2106  ;;  %p3183_p5 = pnand %p3182_p3, %p3176_p0 }
 0x232   : > { %v1531_v6 = vpop.permute.xlu1 %1530  ;;  %2182 = vst.msk [vmem:[#allocation3 + $0xa8] sm:$0xff] %vm2160_vm10, %v2107_v29 }
 0x233   : > { %v2213_v19 = vld [vmem:[#allocation3 + $0xa0] sm:$0xff]  ;;  %1604 = vst.msk [vmem:[#allocation3 + $0xb8] sm:$0xff] %vm1580_vm7, %v1531_v6 }
 0x234   : > { %3083 = vmatprep.mubr.msk.f32.mxu1 %vm2229_vm11, %v2213_v19 }
 0x235   : > { %v1723_v5 = vpop.permute.xlu0 %1722 }
 0x236   : > { %v1147_v38 = vpop.permute.xlu1 %1146  ;;  %1797 = vst.msk [vmem:[#allocation3 + $0xb0] sm:$0xff] %vm1774_vm8, %v1723_v5 }
 0x237   : > { %1219 = vst.msk [vmem:[#allocation3 + $0xc0] sm:$0xff] %vm1194_vm5, %v1147_v38 }
 0x239   : > { %v1725_v36 = vpop.permute.xlu0 %1724  ;;  %v2214_v60 = vld [vmem:[#allocation3 + $0xa8] sm:$0xff] }
 0x23a   : > { %v1916_v39 = vpop.permute.xlu1 %1915  ;;  %1798 = vst.msk [vmem:[#allocation3 + $0xb8] sm:$0xff] %vm1774_vm8, %v1725_v36  ;;  %3084 = vmatmul.mubr.msk.f32.gmra.mxu1 %vm2229_vm11, %v2214_v60 }
 0x23b   : > { %1990 = vst.msk [vmem:[#allocation3 + $0xb0] sm:$0xff] %vm1967_vm9, %v1916_v39  ;;  %v3058_v40 = vpop.f32.mrf.mxu0 }
 0x23c   : > { %2559 = vst.msk [vmem:[%s4237_s19 + $0x18] sm:$0xff] %vm2555_vm12, %v3058_v40  ;;  %v2660_v58 = vmul.f32 %v3058_v40, %v3058_v40  ;;  %v2593_v33 = vsel %vm2555_vm12, %v3058_v40, 0.0 }
 0x23d   : > { %v2406_v53 = vpop.f32.mrf.mxu0  ;;  %v1149_v59 = vpop.permute.xlu0 %1148 }
 0x23e   : > { %2558 = vst.msk [vmem:[%s4237_s19 + $0x10] sm:$0xff] %vm2555_vm12, %v2406_v53  ;;  %v2591_v21 = vsel %vm2555_vm12, %v2406_v53, 0.0  ;;  %v2659_v16 = vmul.f32 %v2406_v53, %v2406_v53  ;;  %v1340_v22 = vpop.permute.xlu1 %1339  ;;  %v2694_v43 = vsel %vm2555_vm12, %v2660_v58, 0.0 }
 0x23f   : > { %v2592_v41 = vadd.f32 %v2591_v21, %v2590_v54  ;;  %1220 = vst.msk [vmem:[#allocation3 + $0xc8] sm:$0xff] %vm1194_vm5, %v1149_v59 }
 0x240   : > { %1412 = vst.msk [vmem:[#allocation3 + $0xc0] sm:$0xff] %vm1387_vm6, %v1340_v22  ;;  %v2692_v8 = vsel %vm2555_vm12, %v2659_v16, 0.0 }
 0x241   : > { %v2693_v50 = vadd.f32 %v2692_v8, %v2691_v20  ;;  %v2594_v13 = vadd.f32 %v2593_v33, %v2592_v41  ;;  %v1918_v7 = vpop.permute.xlu0 %1917 }
 0x242   : > { %v2109_v52 = vpop.permute.xlu1 %2108  ;;  %1991 = vst.msk [vmem:[#allocation3 + $0xb8] sm:$0xff] %vm1967_vm9, %v1918_v7 }
 0x243   : > { %2183 = vst.msk [vmem:[#allocation3 + $0xb0] sm:$0xff] %vm2160_vm10, %v2109_v52  ;;  %v2695_v0 = vadd.f32 %v2694_v43, %v2693_v50 }
 0x245   : > { %v1342_v28 = vpop.permute.xlu0 %1341 }
 0x246   : > { %v1533_v62 = vpop.permute.xlu1 %1532  ;;  %1413 = vst.msk [vmem:[#allocation3 + $0xc8] sm:$0xff] %vm1387_vm6, %v1342_v28 }
 0x247   : > { %1605 = vst.msk [vmem:[#allocation3 + $0xc0] sm:$0xff] %vm1580_vm7, %v1533_v62 }
 0x249   : > { %v2111_v63 = vpop.permute.xlu0 %2110 }
 0x24a   : > { %v1535_v61 = vpop.permute.xlu1 %1534  ;;  %v2215_v42 = vld [vmem:[#allocation3 + $0xb0] sm:$0xff]  ;;  %2184 = vst.msk [vmem:[#allocation3 + $0xb8] sm:$0xff] %vm2160_vm10, %v2111_v63 }
 0x24b   : > { %1606 = vst.msk [vmem:[#allocation3 + $0xc8] sm:$0xff] %vm1580_vm7, %v1535_v61  ;;  %3086 = vmatprep.mubr.msk.f32.mxu1 %vm2229_vm11, %v2215_v42 }
 0x24d   : > { %v1727_v46 = vpop.permute.xlu0 %1726 }
 0x24e   : > { %v1151_v48 = vpop.permute.xlu1 %1150  ;;  %1799 = vst.msk [vmem:[#allocation3 + $0xc0] sm:$0xff] %vm1774_vm8, %v1727_v46 }
 0x24f   : > { %1221 = vst.msk [vmem:[#allocation3 + $0xd0] sm:$0xff] %vm1194_vm5, %v1151_v48  ;;  %v3061_v45 = vpop.f32.mrf.mxu0 }
 0x250   : > { %2561 = vst.msk [vmem:[%s4237_s19 + $0x28] sm:$0xff] %vm2555_vm12, %v3061_v45  ;;  %v2662_v10 = vmul.f32 %v3061_v45, %v3061_v45  ;;  %v2597_v14 = vsel %vm2555_vm12, %v3061_v45, 0.0 }
 0x251   : > { %v2416_v30 = vpop.f32.mrf.mxu0  ;;  %v1729_v47 = vpop.permute.xlu0 %1728  ;;  %v2216_v2 = vld [vmem:[#allocation3 + $0xb8] sm:$0xff] }
 0x252   : > { %2560 = vst.msk [vmem:[%s4237_s19 + $0x20] sm:$0xff] %vm2555_vm12, %v2416_v30  ;;  %v2595_v49 = vsel %vm2555_vm12, %v2416_v30, 0.0  ;;  %v2661_v15 = vmul.f32 %v2416_v30, %v2416_v30  ;;  %v1920_v44 = vpop.permute.xlu1 %1919  ;;  %3087 = vmatmul.mubr.msk.f32.gmra.mxu1 %vm2229_vm11, %v2216_v2  ;;  %v2698_v24 = vsel %vm2555_vm12, %v2662_v10, 0.0 }
 0x253   : > { %v2596_v9 = vadd.f32 %v2595_v49, %v2594_v13  ;;  %1800 = vst.msk [vmem:[#allocation3 + $0xc8] sm:$0xff] %vm1774_vm8, %v1729_v47 }
 0x254   : > { %1992 = vst.msk [vmem:[#allocation3 + $0xc0] sm:$0xff] %vm1967_vm9, %v1920_v44  ;;  %v2696_v1 = vsel %vm2555_vm12, %v2661_v15, 0.0 }
 0x255   : > { %v2697_v56 = vadd.f32 %v2696_v1, %v2695_v0  ;;  %v2598_v23 = vadd.f32 %v2597_v14, %v2596_v9  ;;  %v1153_v27 = vpop.permute.xlu0 %1152 }
 0x256   : > { %v1344_v25 = vpop.permute.xlu1 %1343  ;;  %1222 = vst.msk [vmem:[#allocation3 + $0xd8] sm:$0xff] %vm1194_vm5, %v1153_v27 }
 0x257   : > { %1414 = vst.msk [vmem:[#allocation3 + $0xd0] sm:$0xff] %vm1387_vm6, %v1344_v25  ;;  %v2699_v26 = vadd.f32 %v2698_v24, %v2697_v56 }
 0x259   : > { %v1922_v18 = vpop.permute.xlu0 %1921 }
 0x25a   : > { %v2113_v34 = vpop.permute.xlu1 %2112  ;;  %1993 = vst.msk [vmem:[#allocation3 + $0xc8] sm:$0xff] %vm1967_vm9, %v1922_v18 }
 0x25b   : > { %2185 = vst.msk [vmem:[#allocation3 + $0xc0] sm:$0xff] %vm2160_vm10, %v2113_v34 }
 0x25d   : > { %v1346_v31 = vpop.permute.xlu0 %1345 }
 0x25e   : > { %v1537_v4 = vpop.permute.xlu1 %1536  ;;  %1415 = vst.msk [vmem:[#allocation3 + $0xd8] sm:$0xff] %vm1387_vm6, %v1346_v31 }
 0x25f   : > { %1607 = vst.msk [vmem:[#allocation3 + $0xd0] sm:$0xff] %vm1580_vm7, %v1537_v4 }
 0x261   : > { %v2115_v17 = vpop.permute.xlu0 %2114 }
 0x262   : > { %v1539_v12 = vpop.permute.xlu1 %1538  ;;  %v2217_v3 = vld [vmem:[#allocation3 + $0xc0] sm:$0xff]  ;;  %2186 = vst.msk [vmem:[#allocation3 + $0xc8] sm:$0xff] %vm2160_vm10, %v2115_v17 }
 0x263   : > { %1608 = vst.msk [vmem:[#allocation3 + $0xd8] sm:$0xff] %vm1580_vm7, %v1539_v12  ;;  %v3064_v32 = vpop.f32.mrf.mxu0  ;;  %3089 = vmatprep.mubr.msk.f32.mxu1 %vm2229_vm11, %v2217_v3 }
 0x264   : > { %2563 = vst.msk [vmem:[%s4237_s19 + $0x38] sm:$0xff] %vm2555_vm12, %v3064_v32  ;;  %v2664_v35 = vmul.f32 %v3064_v32, %v3064_v32  ;;  %v2601_v37 = vsel %vm2555_vm12, %v3064_v32, 0.0 }
 0x265   : > { %v2426_v55 = vpop.f32.mrf.mxu0  ;;  %v1731_v57 = vpop.permute.xlu0 %1730 }
 0x266   : > { %2562 = vst.msk [vmem:[%s4237_s19 + $0x30] sm:$0xff] %vm2555_vm12, %v2426_v55  ;;  %v2599_v51 = vsel %vm2555_vm12, %v2426_v55, 0.0  ;;  %v2663_v54 = vmul.f32 %v2426_v55, %v2426_v55  ;;  %v1155_v20 = vpop.permute.xlu1 %1154  ;;  %v2702_v5 = vsel %vm2555_vm12, %v2664_v35, 0.0 }
 0x267   : > { %v2600_v11 = vadd.f32 %v2599_v51, %v2598_v23  ;;  %1801 = vst.msk [vmem:[#allocation3 + $0xd0] sm:$0xff] %vm1774_vm8, %v1731_v57 }
 0x268   : > { %1223 = vst.msk [vmem:[#allocation3 + $0xe0] sm:$0xff] %vm1194_vm5, %v1155_v20  ;;  %v2700_v29 = vsel %vm2555_vm12, %v2663_v54, 0.0 }
 0x269   : > { %v2701_v6 = vadd.f32 %v2700_v29, %v2699_v26  ;;  %v2602_v19 = vadd.f32 %v2601_v37, %v2600_v11  ;;  %v1733_v38 = vpop.permute.xlu0 %1732  ;;  %v2218_v39 = vld [vmem:[#allocation3 + $0xc8] sm:$0xff] }
 0x26a   : > { %v1924_v36 = vpop.permute.xlu1 %1923  ;;  %1802 = vst.msk [vmem:[#allocation3 + $0xd8] sm:$0xff] %vm1774_vm8, %v1733_v38  ;;  %3090 = vmatmul.mubr.msk.f32.gmra.mxu1 %vm2229_vm11, %v2218_v39 }
 0x26b   : > { %1994 = vst.msk [vmem:[#allocation3 + $0xd0] sm:$0xff] %vm1967_vm9, %v1924_v36  ;;  %v2703_v60 = vadd.f32 %v2702_v5, %v2701_v6 }
 0x26d   : > { %v1157_v40 = vpop.permute.xlu0 %1156 }
 0x26e   : > { %v1348_v53 = vpop.permute.xlu1 %1347  ;;  %1224 = vst.msk [vmem:[#allocation3 + $0xe8] sm:$0xff] %vm1194_vm5, %v1157_v40 }
 0x26f   : > { %1416 = vst.msk [vmem:[#allocation3 + $0xe0] sm:$0xff] %vm1387_vm6, %v1348_v53 }
 0x271   : > { %v1926_v58 = vpop.permute.xlu0 %1925 }
 0x272   : > { %v2117_v21 = vpop.permute.xlu1 %2116  ;;  %1995 = vst.msk [vmem:[#allocation3 + $0xd8] sm:$0xff] %vm1967_vm9, %v1926_v58 }
 0x273   : > { %2187 = vst.msk [vmem:[#allocation3 + $0xd0] sm:$0xff] %vm2160_vm10, %v2117_v21 }
 0x275   : > { %v1350_v16 = vpop.permute.xlu0 %1349 }
 0x276   : > { %v1541_v59 = vpop.permute.xlu1 %1540  ;;  %1417 = vst.msk [vmem:[#allocation3 + $0xe8] sm:$0xff] %vm1387_vm6, %v1350_v16 }
 0x277   : > { %1609 = vst.msk [vmem:[#allocation3 + $0xe0] sm:$0xff] %vm1580_vm7, %v1541_v59  ;;  %v3067_v22 = vpop.f32.mrf.mxu0 }
 0x278   : > { %2565 = vst.msk [vmem:[%s4237_s19 + $0x48] sm:$0xff] %vm2555_vm12, %v3067_v22  ;;  %v2666_v33 = vmul.f32 %v3067_v22, %v3067_v22  ;;  %v2605_v0 = vsel %vm2555_vm12, %v3067_v22, 0.0 }
 0x279   : > { %v2436_v41 = vpop.f32.mrf.mxu0  ;;  %v2119_v13 = vpop.permute.xlu0 %2118 }
 0x27a   : > { %2564 = vst.msk [vmem:[%s4237_s19 + $0x40] sm:$0xff] %vm2555_vm12, %v2436_v41  ;;  %v2603_v8 = vsel %vm2555_vm12, %v2436_v41, 0.0  ;;  %v2665_v50 = vmul.f32 %v2436_v41, %v2436_v41  ;;  %v1543_v43 = vpop.permute.xlu1 %1542  ;;  %v2219_v7 = vld [vmem:[#allocation3 + $0xd0] sm:$0xff]  ;;  %v2706_v61 = vsel %vm2555_vm12, %v2666_v33, 0.0 }
 0x27b   : > { %v2604_v52 = vadd.f32 %v2603_v8, %v2602_v19  ;;  %2188 = vst.msk [vmem:[#allocation3 + $0xd8] sm:$0xff] %vm2160_vm10, %v2119_v13  ;;  %3092 = vmatprep.mubr.msk.f32.mxu1 %vm2229_vm11, %v2219_v7 }
 0x27c   : > { %1610 = vst.msk [vmem:[#allocation3 + $0xe8] sm:$0xff] %vm1580_vm7, %v1543_v43  ;;  %v2704_v28 = vsel %vm2555_vm12, %v2665_v50, 0.0 }
 0x27d   : > { %v2705_v62 = vadd.f32 %v2704_v28, %v2703_v60  ;;  %v2606_v63 = vadd.f32 %v2605_v0, %v2604_v52  ;;  %v1735_v42 = vpop.permute.xlu0 %1734 }
 0x27e   : > { %v1159_v46 = vpop.permute.xlu1 %1158  ;;  %1803 = vst.msk [vmem:[#allocation3 + $0xe0] sm:$0xff] %vm1774_vm8, %v1735_v42 }
 0x27f   : > { %1225 = vst.msk [vmem:[#allocation3 + $0xf0] sm:$0xff] %vm1194_vm5, %v1159_v46  ;;  %v2707_v48 = vadd.f32 %v2706_v61, %v2705_v62 }
 0x281   : > { %v1737_v45 = vpop.permute.xlu0 %1736 }
 0x282   : > { %v1928_v30 = vpop.permute.xlu1 %1927  ;;  %v2220_v10 = vld [vmem:[#allocation3 + $0xd8] sm:$0xff]  ;;  %1804 = vst.msk [vmem:[#allocation3 + $0xe8] sm:$0xff] %vm1774_vm8, %v1737_v45 }
 0x283   : > { %1996 = vst.msk [vmem:[#allocation3 + $0xe0] sm:$0xff] %vm1967_vm9, %v1928_v30  ;;  %3093 = vmatmul.mubr.msk.f32.gmra.mxu1 %vm2229_vm11, %v2220_v10 }
 0x285   : > { %v1161_v49 = vpop.permute.xlu0 %1160 }
 0x286   : > { %v1352_v15 = vpop.permute.xlu1 %1351  ;;  %1226 = vst.msk [vmem:[#allocation3 + $0xf8] sm:$0xff] %vm1194_vm5, %v1161_v49 }
 0x287   : > { %1418 = vst.msk [vmem:[#allocation3 + $0xf0] sm:$0xff] %vm1387_vm6, %v1352_v15 }
 0x289   : > { %v1930_v47 = vpop.permute.xlu0 %1929 }
 0x28a   : > { %v2121_v44 = vpop.permute.xlu1 %2120  ;;  %1997 = vst.msk [vmem:[#allocation3 + $0xe8] sm:$0xff] %vm1967_vm9, %v1930_v47 }
 0x28b   : > { %2189 = vst.msk [vmem:[#allocation3 + $0xe0] sm:$0xff] %vm2160_vm10, %v2121_v44  ;;  %v3070_v2 = vpop.f32.mrf.mxu0 }
 0x28c   : > { %2567 = vst.msk [vmem:[%s4237_s19 + $0x58] sm:$0xff] %vm2555_vm12, %v3070_v2  ;;  %v2668_v14 = vmul.f32 %v3070_v2, %v3070_v2  ;;  %v2609_v25 = vsel %vm2555_vm12, %v3070_v2, 0.0 }
 0x28d   : > { %v2446_v9 = vpop.f32.mrf.mxu0  ;;  %v1354_v23 = vpop.permute.xlu0 %1353 }
 0x28e   : > { %2566 = vst.msk [vmem:[%s4237_s19 + $0x50] sm:$0xff] %vm2555_vm12, %v2446_v9  ;;  %v2607_v1 = vsel %vm2555_vm12, %v2446_v9, 0.0  ;;  %v2667_v56 = vmul.f32 %v2446_v9, %v2446_v9  ;;  %v1545_v24 = vpop.permute.xlu1 %1544  ;;  %v2710_v31 = vsel %vm2555_vm12, %v2668_v14, 0.0 }
 0x28f   : > { %v2608_v27 = vadd.f32 %v2607_v1, %v2606_v63  ;;  %1419 = vst.msk [vmem:[#allocation3 + $0xf8] sm:$0xff] %vm1387_vm6, %v1354_v23 }
 0x290   : > { %1611 = vst.msk [vmem:[#allocation3 + $0xf0] sm:$0xff] %vm1580_vm7, %v1545_v24  ;;  %v2708_v26 = vsel %vm2555_vm12, %v2667_v56, 0.0 }
 0x291   : > { %v2709_v18 = vadd.f32 %v2708_v26, %v2707_v48  ;;  %v2610_v34 = vadd.f32 %v2609_v25, %v2608_v27  ;;  %v2123_v4 = vpop.permute.xlu0 %2122 }
 0x292   : > { %v1547_v17 = vpop.permute.xlu1 %1546  ;;  %v2221_v12 = vld [vmem:[#allocation3 + $0xe0] sm:$0xff]  ;;  %2190 = vst.msk [vmem:[#allocation3 + $0xe8] sm:$0xff] %vm2160_vm10, %v2123_v4 }
 0x293   : > { %1612 = vst.msk [vmem:[#allocation3 + $0xf8] sm:$0xff] %vm1580_vm7, %v1547_v17  ;;  %3095 = vmatprep.mubr.msk.f32.mxu1 %vm2229_vm11, %v2221_v12  ;;  %v2711_v3 = vadd.f32 %v2710_v31, %v2709_v18 }
 0x295   : > { %v1739_v32 = vpop.permute.xlu0 %1738 }
 0x296   : > { %v1741_v55 = vpop.permute.xlu1 %1740  ;;  %1805 = vst.msk [vmem:[#allocation3 + $0xf0] sm:$0xff] %vm1774_vm8, %v1739_v32 }
 0x297   : > { %1806 = vst.msk [vmem:[#allocation3 + $0xf8] sm:$0xff] %vm1774_vm8, %v1741_v55 }
 0x299   : > { %v1932_v35 = vpop.permute.xlu0 %1931  ;;  %v2222_v54 = vld [vmem:[#allocation3 + $0xe8] sm:$0xff] }
 0x29a   : > { %v1934_v51 = vpop.permute.xlu1 %1933  ;;  %1998 = vst.msk [vmem:[#allocation3 + $0xf0] sm:$0xff] %vm1967_vm9, %v1932_v35  ;;  %3096 = vmatmul.mubr.msk.f32.gmra.mxu1 %vm2229_vm11, %v2222_v54 }
 0x29b   : > { %1999 = vst.msk [vmem:[#allocation3 + $0xf8] sm:$0xff] %vm1967_vm9, %v1934_v51 }
 0x29d   : > { %v2125_v57 = vpop.permute.xlu0 %2124 }
 0x29e   : > { %v2127_v20 = vpop.permute.xlu1 %2126  ;;  %2191 = vst.msk [vmem:[#allocation3 + $0xf0] sm:$0xff] %vm2160_vm10, %v2125_v57 }
 0x29f   : > { %2192 = vst.msk [vmem:[#allocation3 + $0xf8] sm:$0xff] %vm2160_vm10, %v2127_v20  ;;  %v3073_v11 = vpop.f32.mrf.mxu0 }
 0x2a0   : > { %2569 = vst.msk [vmem:[%s4237_s19 + $0x68] sm:$0xff] %vm2555_vm12, %v3073_v11  ;;  %v2670_v29 = vmul.f32 %v3073_v11, %v3073_v11  ;;  %v2613_v38 = vsel %vm2555_vm12, %v3073_v11, 0.0 }
 0x2a1   : > { %v2456_v37 = vpop.f32.mrf.mxu0 }
 0x2a2   : > { %2568 = vst.msk [vmem:[%s4237_s19 + $0x60] sm:$0xff] %vm2555_vm12, %v2456_v37  ;;  %v2611_v6 = vsel %vm2555_vm12, %v2456_v37, 0.0  ;;  %v2669_v19 = vmul.f32 %v2456_v37, %v2456_v37  ;;  %v2714_v40 = vsel %vm2555_vm12, %v2670_v29, 0.0 }
 0x2a3   : > { %v2612_v5 = vadd.f32 %v2611_v6, %v2610_v34 }
 0x2a4   : > { %v2712_v36 = vsel %vm2555_vm12, %v2669_v19, 0.0 }
 0x2a5   : > { %v2713_v39 = vadd.f32 %v2712_v36, %v2711_v3  ;;  %v2614_v60 = vadd.f32 %v2613_v38, %v2612_v5  ;;  %v2223_v53 = vld [vmem:[#allocation3 + $0xf0] sm:$0xff] }
 0x2a6   : > { %v2224_v58 = vld [vmem:[#allocation3 + $0xf8] sm:$0xff]  ;;  %3098 = vmatprep.mubr.msk.f32.mxu1 %vm2229_vm11, %v2223_v53 }
 0x2a7   : > { %v2715_v21 = vadd.f32 %v2714_v40, %v2713_v39  ;;  %3099 = vmatmul.mubr.msk.f32.gmra.mxu1 %vm2229_vm11, %v2224_v58 }
 0x2b3   : > { %v3076_v16 = vpop.f32.mrf.mxu0 }
 0x2b4   : > { %2571 = vst.msk [vmem:[%s4237_s19 + $0x78] sm:$0xff] %vm2555_vm12, %v3076_v16  ;;  %v2672_v22 = vmul.f32 %v3076_v16, %v3076_v16  ;;  %v2617_v50 = vsel %vm2555_vm12, %v3076_v16, 0.0 }
 0x2b5   : > { %v2466_v59 = vpop.f32.mrf.mxu0 }
 0x2b6   : > { %2570 = vst.msk [vmem:[%s4237_s19 + $0x70] sm:$0xff] %vm2555_vm12, %v2466_v59  ;;  %v2615_v41 = vsel %vm2555_vm12, %v2466_v59, 0.0  ;;  %v2671_v33 = vmul.f32 %v2466_v59, %v2466_v59  ;;  %v2718_v52 = vsel %vm2555_vm12, %v2672_v22, 0.0 }
 0x2b7   : > { %v2616_v8 = vadd.f32 %v2615_v41, %v2614_v60 }
 0x2b8   : > { %v2716_v13 = vsel %vm2555_vm12, %v2671_v33, 0.0 }
 0x2b9   : > { %v2618_v43 = vadd.f32 %v2617_v50, %v2616_v8  ;;  %v2717_v7 = vadd.f32 %v2716_v13, %v2715_v21 }
 0x2bb   : > { %v2719_v0 = vadd.f32 %v2718_v52, %v2717_v7 }
 0x2ca   : > { %v3079_v28 = vpop.f32.mrf.mxu1 }
 0x2cb   : > { %2573 = vst.msk [vmem:[%s4237_s19 + $0x88] sm:$0xff] %vm2555_vm12, %v3079_v28  ;;  %v2674_v63 = vmul.f32 %v3079_v28, %v3079_v28  ;;  %v2621_v48 = vsel %vm2555_vm12, %v3079_v28, 0.0 }
 0x2cc   : > { %v2476_v62 = vpop.f32.mrf.mxu1 }
 0x2cd   : > { %2572 = vst.msk [vmem:[%s4237_s19 + $0x80] sm:$0xff] %vm2555_vm12, %v2476_v62  ;;  %v2619_v61 = vsel %vm2555_vm12, %v2476_v62, 0.0  ;;  %v2673_v42 = vmul.f32 %v2476_v62, %v2476_v62  ;;  %v2722_v49 = vsel %vm2555_vm12, %v2674_v63, 0.0 }
 0x2ce   : > { %v2620_v46 = vadd.f32 %v2619_v61, %v2618_v43 }
 0x2cf   : > { %v2720_v45 = vsel %vm2555_vm12, %v2673_v42, 0.0 }
 0x2d0   : > { %v2721_v30 = vadd.f32 %v2720_v45, %v2719_v0  ;;  %v2622_v10 = vadd.f32 %v2621_v48, %v2620_v46 }
 0x2d2   : > { %v2723_v15 = vadd.f32 %v2722_v49, %v2721_v30 }
 0x2e2   : > { %v3082_v47 = vpop.f32.mrf.mxu1 }
 0x2e3   : > { %2575 = vst.msk [vmem:[%s4237_s19 + $0x98] sm:$0xff] %vm2555_vm12, %v3082_v47  ;;  %v2676_v2 = vmul.f32 %v3082_v47, %v3082_v47  ;;  %v2625_v56 = vsel %vm2555_vm12, %v3082_v47, 0.0 }
 0x2e4   : > { %v2486_v44 = vpop.f32.mrf.mxu1 }
 0x2e5   : > { %2574 = vst.msk [vmem:[%s4237_s19 + $0x90] sm:$0xff] %vm2555_vm12, %v2486_v44  ;;  %v2623_v9 = vsel %vm2555_vm12, %v2486_v44, 0.0  ;;  %v2675_v14 = vmul.f32 %v2486_v44, %v2486_v44  ;;  %v2726_v25 = vsel %vm2555_vm12, %v2676_v2, 0.0 }
 0x2e6   : > { %v2624_v1 = vadd.f32 %v2623_v9, %v2622_v10 }
 0x2e7   : > { %v2724_v23 = vsel %vm2555_vm12, %v2675_v14, 0.0 }
 0x2e8   : > { %v2725_v24 = vadd.f32 %v2724_v23, %v2723_v15  ;;  %v2626_v27 = vadd.f32 %v2625_v56, %v2624_v1 }
 0x2ea   : > { %v2727_v26 = vadd.f32 %v2726_v25, %v2725_v24 }
 0x2fa   : > { %v3085_v18 = vpop.f32.mrf.mxu1 }
 0x2fb   : > { %2577 = vst.msk [vmem:[%s4237_s19 + $0xa8] sm:$0xff] %vm2555_vm12, %v3085_v18  ;;  %v2678_v31 = vmul.f32 %v3085_v18, %v3085_v18  ;;  %v2629_v3 = vsel %vm2555_vm12, %v3085_v18, 0.0 }
 0x2fc   : > { %v2496_v34 = vpop.f32.mrf.mxu1 }
 0x2fd   : > { %2576 = vst.msk [vmem:[%s4237_s19 + $0xa0] sm:$0xff] %vm2555_vm12, %v2496_v34  ;;  %v2627_v4 = vsel %vm2555_vm12, %v2496_v34, 0.0  ;;  %v2677_v17 = vmul.f32 %v2496_v34, %v2496_v34  ;;  %v2730_v51 = vsel %vm2555_vm12, %v2678_v31, 0.0 }
 0x2fe   : > { %v2628_v12 = vadd.f32 %v2627_v4, %v2626_v27 }
 0x2ff   : > { %v2728_v32 = vsel %vm2555_vm12, %v2677_v17, 0.0 }
 0x300   : > { %v2729_v55 = vadd.f32 %v2728_v32, %v2727_v26  ;;  %v2630_v35 = vadd.f32 %v2629_v3, %v2628_v12 }
 0x302   : > { %v2731_v54 = vadd.f32 %v2730_v51, %v2729_v55 }
 0x312   : > { %v3088_v57 = vpop.f32.mrf.mxu1 }
 0x313   : > { %2579 = vst.msk [vmem:[%s4237_s19 + $0xb8] sm:$0xff] %vm2555_vm12, %v3088_v57  ;;  %v2680_v11 = vmul.f32 %v3088_v57, %v3088_v57  ;;  %v2633_v19 = vsel %vm2555_vm12, %v3088_v57, 0.0 }
 0x314   : > { %v2506_v20 = vpop.f32.mrf.mxu1 }
 0x315   : > { %2578 = vst.msk [vmem:[%s4237_s19 + $0xb0] sm:$0xff] %vm2555_vm12, %v2506_v20  ;;  %v2631_v37 = vsel %vm2555_vm12, %v2506_v20, 0.0  ;;  %v2679_v29 = vmul.f32 %v2506_v20, %v2506_v20  ;;  %v2734_v39 = vsel %vm2555_vm12, %v2680_v11, 0.0 }
 0x316   : > { %v2632_v6 = vadd.f32 %v2631_v37, %v2630_v35 }
 0x317   : > { %v2732_v5 = vsel %vm2555_vm12, %v2679_v29, 0.0 }
 0x318   : > { %v2733_v38 = vadd.f32 %v2732_v5, %v2731_v54  ;;  %v2634_v36 = vadd.f32 %v2633_v19, %v2632_v6 }
 0x31a   : > { %v2735_v60 = vadd.f32 %v2734_v39, %v2733_v38 }
 0x32a   : > { %v3091_v40 = vpop.f32.mrf.mxu1 }
 0x32b   : > { %2581 = vst.msk [vmem:[%s4237_s19 + $0xc8] sm:$0xff] %vm2555_vm12, %v3091_v40  ;;  %v2682_v33 = vmul.f32 %v3091_v40, %v3091_v40  ;;  %v2637_v43 = vsel %vm2555_vm12, %v3091_v40, 0.0 }
 0x32c   : > { %v2516_v53 = vpop.f32.mrf.mxu1 }
 0x32d   : > { %2580 = vst.msk [vmem:[%s4237_s19 + $0xc0] sm:$0xff] %vm2555_vm12, %v2516_v53  ;;  %v2681_v16 = vmul.f32 %v2516_v53, %v2516_v53  ;;  %v2635_v59 = vsel %vm2555_vm12, %v2516_v53, 0.0  ;;  %v2738_v28 = vsel %vm2555_vm12, %v2682_v33, 0.0 }
 0x32e   : > { %v2636_v41 = vadd.f32 %v2635_v59, %v2634_v36 }
 0x32f   : > { %v2736_v22 = vsel %vm2555_vm12, %v2681_v16, 0.0 }
 0x330   : > { %v2737_v13 = vadd.f32 %v2736_v22, %v2735_v60  ;;  %v2638_v0 = vadd.f32 %v2637_v43, %v2636_v41 }
 0x332   : > { %v2739_v61 = vadd.f32 %v2738_v28, %v2737_v13 }
 0x343   : > { %v3094_v58 = vpop.f32.mrf.mxu1 }
 0x344   : > { %2583 = vst.msk [vmem:[%s4237_s19 + $0xd8] sm:$0xff] %vm2555_vm12, %v3094_v58  ;;  %v2684_v42 = vmul.f32 %v3094_v58, %v3094_v58  ;;  %v2641_v45 = vsel %vm2555_vm12, %v3094_v58, 0.0 }
 0x345   : > { %v2526_v21 = vpop.f32.mrf.mxu1 }
 0x346   : > { %2582 = vst.msk [vmem:[%s4237_s19 + $0xd0] sm:$0xff] %vm2555_vm12, %v2526_v21  ;;  %v2683_v8 = vmul.f32 %v2526_v21, %v2526_v21  ;;  %v2639_v7 = vsel %vm2555_vm12, %v2526_v21, 0.0  ;;  %v2742_v49 = vsel %vm2555_vm12, %v2684_v42, 0.0 }
 0x347   : > { %v2640_v63 = vadd.f32 %v2639_v7, %v2638_v0 }
 0x348   : > { %v2740_v62 = vsel %vm2555_vm12, %v2683_v8, 0.0 }
 0x349   : > { %v2741_v48 = vadd.f32 %v2740_v62, %v2739_v61  ;;  %v2642_v10 = vadd.f32 %v2641_v45, %v2640_v63 }
 0x34b   : > { %v2743_v44 = vadd.f32 %v2742_v49, %v2741_v48 }
 0x35a   : > { %v3097_v50 = vpop.f32.mrf.mxu1 }
 0x35b   : > { %2585 = vst.msk [vmem:[%s4237_s19 + $0xe8] sm:$0xff] %vm2555_vm12, %v3097_v50  ;;  %v2686_v2 = vmul.f32 %v3097_v50, %v3097_v50  ;;  %v2645_v1 = vsel %vm2555_vm12, %v3097_v50, 0.0 }
 0x35c   : > { %v2536_v52 = vpop.f32.mrf.mxu1 }
 0x35d   : > { %2584 = vst.msk [vmem:[%s4237_s19 + $0xe0] sm:$0xff] %vm2555_vm12, %v2536_v52  ;;  %v2685_v46 = vmul.f32 %v2536_v52, %v2536_v52  ;;  %v2643_v30 = vsel %vm2555_vm12, %v2536_v52, 0.0  ;;  %v2746_v24 = vsel %vm2555_vm12, %v2686_v2, 0.0 }
 0x35e   : > { %v2644_v47 = vadd.f32 %v2643_v30, %v2642_v10 }
 0x35f   : > { %v2744_v15 = vsel %vm2555_vm12, %v2685_v46, 0.0 }
 0x360   : > { %v2745_v9 = vadd.f32 %v2744_v15, %v2743_v44  ;;  %v2646_v23 = vadd.f32 %v2645_v1, %v2644_v47 }
 0x362   : > { %v2747_v34 = vadd.f32 %v2746_v24, %v2745_v9 }
 0x367   : > { %v3100_v14 = vpop.f32.mrf.mxu1 }
 0x368   : > { %2587 = vst.msk [vmem:[%s4237_s19 + $0xf8] sm:$0xff] %vm2555_vm12, %v3100_v14  ;;  %v2688_v27 = vmul.f32 %v3100_v14, %v3100_v14  ;;  %v2649_v31 = vsel %vm2555_vm12, %v3100_v14, 0.0 }
 0x369   : > { %v2546_v56 = vpop.f32.mrf.mxu1 }
 0x36a   : > { %2586 = vst.msk [vmem:[%s4237_s19 + $0xf0] sm:$0xff] %vm2555_vm12, %v2546_v56  ;;  %v2647_v25 = vsel %vm2555_vm12, %v2546_v56, 0.0  ;;  %v2687_v26 = vmul.f32 %v2546_v56, %v2546_v56  ;;  %v2750_v3 = vsel %vm2555_vm12, %v2688_v27, 0.0 }
 0x36b   : > { %v2648_v18 = vadd.f32 %v2647_v25, %v2646_v23 }
 0x36c   : > { %v2748_v4 = vsel %vm2555_vm12, %v2687_v26, 0.0 }
 0x36d   : > { %v2650_v17 = vadd.f32 %v2649_v31, %v2648_v18  ;;  %v2749_v12 = vadd.f32 %v2748_v4, %v2747_v34 }
 0x36f   : > { %v2651_v32 = vrot.slane %v2650_v17, 4  ;;  %v2751_v55 = vadd.f32 %v2750_v3, %v2749_v12 }
 0x371   : > { %v2652_v35 = vadd.f32 %v2651_v32, %v2650_v17  ;;  %v2752_v51 = vrot.slane %v2751_v55, 4 }
 0x373   : > { %v2653_v54 = vrot.slane %v2652_v35, 2  ;;  %v2753_v57 = vadd.f32 %v2752_v51, %v2751_v55 }
 0x375   : > { %v2654_v20 = vadd.f32 %v2653_v54, %v2652_v35  ;;  %v2754_v11 = vrot.slane %v2753_v57, 2 }
 0x377   : > { %v2655_v37 = vrot.slane %v2654_v20, 1  ;;  %v2755_v29 = vadd.f32 %v2754_v11, %v2753_v57 }
 0x379   : > { %v2756_v6 = vrot.slane %v2755_v29, 1  ;;  %v2656_v19 = vadd.f32 %v2655_v37, %v2654_v20 }
 0x37b   : > { %v2757_v5 = vadd.f32 %v2756_v6, %v2755_v29 }
 0x37d   : > { %v2759_v38 = vsel %vm2758_vm13, %v2656_v19, %v2757_v5 }
 0x37e   : > { %2761 = vst.msk [vmem:[%s403_s15] sm:$0x3] %vm2760_vm14, %v2759_v38 }
 0x37f   : > { %3186 = shalt.err (!%p3183_p5)
}
 0x380   : > { %s3187_s23 = scalar_lea.hbm %s4450_s10, 32  ;;  %s3191_s14 = scalar_lea.hbm %s4497_s7, 64 }
 0x381   : > { %p3188_p6 = scmp.ne.s32.totalorder %s4450_s10, %s3187_s23  ;;  %p3192_p10 = scmp.lt.s32.totalorder %s4450_s10, %s4497_s7 }
 0x382   : > { %p3193_p11 = scmp.lt.s32.totalorder %s3191_s14, %s3187_s23 }
 0x383   : > { %p3189_p7 = pnand %p3188_p6, %p3341_p4 }
 0x384   : > { %p3194_p12 = por %p3193_p11, %p3192_p10 }
 0x385   : > { %p3190_p9 = pneg %p3189_p7 }
 0x387   : > { %p3195_p13 = pnand %p3194_p12, %p3190_p9 }
 0x389   : > { %3198 = shalt.err (!%p3195_p13)
}
 0x38a   : > { %3109 = dma.vmem_to_hbm [thread:$0]  (%p3341_p4), %s2792_s20, 32, %s4450_s10, %s2773_s17  }
 0x38b PF: > { %p3115_p0 = scmp.ge.s32.totalorder %s3249_s28, 2  ;;  %s2816_s15 = sand.u32 1, %s3229_s24  }
 0x38c   : > { %s2817_s21 = scalar_lea.sflag [#allocation5], %s2816_s15 }
 0x38d   : > { %p3112_p1 = pnand %p3115_p0, %p3348_p8 }
 0x38f   : > { %p3113_p2 = pneg %p3112_p1 }
 0x391   : > { %3224 = dma.done.wait (%p3113_p2), %s2817_s21, 32  }
 0x392   : > { %3226 = vsyncadd (%p3113_p2), %s2817_s21, 4294967264  ;;  %s21_s28 = sadd.s32 1, %s3249_s28   ;;  %s4500_s24 = smov %s3233_s25 }
 0x393   : > { %p18_p3 = scmp.ge.s32.totalorder %s21_s28, 4   ;;  %s4501_s25 = smov %s3237_s26 }
 0x394   : > { %s4502_s26 = smov %s3354_s12  ;;  %s4503_s27 = smov %s3245_s4 }
 0x395   : > { %s4504_s4 = smov %s4506_s30  ;;  %20 = sbr.rel (!%p18_p3) target bundleno = 4 (0x4), region = 100 }
 0x39a   :  { %2822 = vsyncpa [#allocation5], 1 }
 0x39b   :  { %2824 = vsyncpa [#allocation5 + $0x1], 1 }

</bundles_post_ra>
